<compile_context>
chip_gen: v5e
topology: v5e:2x2
jax: 0.10.0
libtpu: 0.0.40
codegen_flags: <defaults>
</compile_context>

<pallas_src>
import functools

import jax
import jax.numpy as jnp
import numpy as np
from jax.experimental import pallas as pl
from jax.experimental.pallas import tpu as pltpu


def _round_up(x, m):
    return (x + m - 1) // m * m


_VMEM_LIMIT = 32 * 1024 * 1024  # explicit scoped-VMEM limit (v5e default is 16 MiB)


def _has_multiple_tensorcores():
    # v7x has 2 TensorCores per chip; shard the V-tiled projection across them
    # by splitting it into its own "parallel" pallas_call.  On 1-TC chips
    # (v5e/v6e) the extra launch is pure overhead, so keep the fused call.
    try:
        kind = jax.devices()[0].device_kind.lower()
    except Exception:
        return False
    return "v7" in kind


# ---------------------------------------------------------------------------
# Shared kernel pieces
# ---------------------------------------------------------------------------
def _gather_e4_rows(idx_ref, e4_hbm, xg_ref, gsem, B):
    """Embedding lookup as B tiny row-DMAs from HBM, indexed from SMEM."""
    def row_copy(b):
        return pltpu.make_async_copy(
            e4_hbm.at[idx_ref[b]], xg_ref.at[b], gsem.at[b])

    for b in range(B):
        row_copy(b).start()
    for b in range(B):
        row_copy(b).wait()


def _lstm_cell(xg, h0, c0, whh, bg, Hp):
    """Gate-blocked single LSTM step (PyTorch gate order i, f, g, o)."""
    gates = xg + jnp.dot(h0, whh, preferred_element_type=jnp.float32) + bg
    i_g = jax.nn.sigmoid(gates[:, 0 * Hp:1 * Hp])
    f_g = jax.nn.sigmoid(gates[:, 1 * Hp:2 * Hp])
    g_g = jnp.tanh(gates[:, 2 * Hp:3 * Hp])
    o_g = jax.nn.sigmoid(gates[:, 3 * Hp:4 * Hp])
    c_n = f_g * c0 + i_g * g_g
    h_n = o_g * jnp.tanh(c_n)
    return h_n, c_n


# ---------------------------------------------------------------------------
# Fused kernel (v5e / v6e): LSTM step at grid step 0 + V-tiled projection
# ---------------------------------------------------------------------------
def _decoder_fused_kernel(
    idx_ref,      # (Bp,)       int32  SMEM  scalar-prefetched token ids
    e4_hbm,       # (Ve, 4*Hp)  f32    HBM   E' = emb @ W_ih^T (gate-blocked)
    whh_ref,      # (Hp, 4*Hp)  f32    VMEM  W_hh^T (gate-blocked, padded)
    bg_ref,       # (1, 4*Hp)   f32    VMEM  b_ih + b_hh (gate-blocked, padded)
    wout_ref,     # (Hc, TN)    bf16   VMEM  W_out^T tile (un-padded contraction)
    bout_ref,     # (1, TN)     f32    VMEM  b_out tile
    h0_ref,       # (Bp, Hp)    f32
    c0_ref,       # (Bp, Hp)    f32
    logits_ref,   # (Bp, TN)    f32    out (tiled over V)
    hn_out_ref,   # (Bp, Hp)    f32    out
    cn_out_ref,   # (Bp, Hp)    f32    out
    xg_ref,       # (Bp, 4*Hp)  f32    scratch: gathered E' rows
    hnb_ref,      # (Bp, Hc)    bf16   scratch: bf16 h_n carried across V tiles
    gsem,         # DMA semaphores (Bp,)
    *,
    B, Hp, Hc,
):
    # ---- one-time LSTM step (grid axis iterates over V tiles) --------------
    @pl.when(pl.program_id(0) == 0)
    def _lstm_step():
        _gather_e4_rows(idx_ref, e4_hbm, xg_ref, gsem, B)
        h_n, c_n = _lstm_cell(xg_ref[...], h0_ref[...], c0_ref[...],
                              whh_ref[...], bg_ref[...], Hp)
        hn_out_ref[...] = h_n
        cn_out_ref[...] = c_n
        # cast once; reused (read-only) by every V tile
        hnb_ref[...] = h_n[:, :Hc].astype(jnp.bfloat16)

    # ---- output projection, tiled over V (bf16 MXU, f32 accumulate) --------
    logits_ref[...] = (
        jnp.dot(hnb_ref[...], wout_ref[...], preferred_element_type=jnp.float32)
        + bout_ref[...]
    )


def _forward_fused(idx_p, h0_p, c0_p, kp, Bp):
    Hp, Hc, Vp, TN = kp["hidden_pad"], kp["hidden_ctr"], kp["vocab_pad"], kp["tile_n"]
    kernel = functools.partial(_decoder_fused_kernel, B=Bp, Hp=Hp, Hc=Hc)

    return pl.pallas_call(
        kernel,
        grid_spec=pltpu.PrefetchScalarGridSpec(
            num_scalar_prefetch=1,
            grid=(Vp // TN,),
            in_specs=[
                pl.BlockSpec(memory_space=pl.ANY),                  # E' stays in HBM
                pl.BlockSpec((Hp, 4 * Hp), lambda j, ids: (0, 0)),  # W_hh^T
                pl.BlockSpec((1, 4 * Hp), lambda j, ids: (0, 0)),   # gate bias
                pl.BlockSpec((Hc, TN), lambda j, ids: (0, j)),      # W_out^T tile
                pl.BlockSpec((1, TN), lambda j, ids: (0, j)),       # b_out tile
                pl.BlockSpec((Bp, Hp), lambda j, ids: (0, 0)),      # h0
                pl.BlockSpec((Bp, Hp), lambda j, ids: (0, 0)),      # c0
            ],
            out_specs=[
                pl.BlockSpec((Bp, TN), lambda j, ids: (0, j)),      # logits tile
                pl.BlockSpec((Bp, Hp), lambda j, ids: (0, 0)),      # h_n
                pl.BlockSpec((Bp, Hp), lambda j, ids: (0, 0)),      # c_n
            ],
            scratch_shapes=[
                pltpu.VMEM((Bp, 4 * Hp), jnp.float32),              # gathered E' rows
                pltpu.VMEM((Bp, Hc), jnp.bfloat16),                 # bf16 h_n carry
                pltpu.SemaphoreType.DMA((Bp,)),
            ],
        ),
        out_shape=[
            jax.ShapeDtypeStruct((Bp, Vp), jnp.float32),
            jax.ShapeDtypeStruct((Bp, Hp), jnp.float32),
            jax.ShapeDtypeStruct((Bp, Hp), jnp.float32),
        ],
        compiler_params=pltpu.CompilerParams(
            # LSTM runs only at step 0 and h_n is carried in scratch across the
            # V axis -> must stay "arbitrary" (sequential on one core).
            dimension_semantics=("arbitrary",),
            vmem_limit_bytes=_VMEM_LIMIT,
        ),
    )(idx_p, kp["e4"], kp["whh"], kp["b_gates"], kp["wout"], kp["b_out"],
      h0_p, c0_p)


# ---------------------------------------------------------------------------
# Split kernels (v7x): tiny LSTM-step call + "parallel" V-tiled projection
# ---------------------------------------------------------------------------
def _lstm_step_kernel(
    idx_ref, e4_hbm, whh_ref, bg_ref, h0_ref, c0_ref,
    hn_out_ref, cn_out_ref, hnb_out_ref,
    xg_ref, gsem, *, B, Hp, Hc,
):
    _gather_e4_rows(idx_ref, e4_hbm, xg_ref, gsem, B)
    h_n, c_n = _lstm_cell(xg_ref[...], h0_ref[...], c0_ref[...],
                          whh_ref[...], bg_ref[...], Hp)
    hn_out_ref[...] = h_n
    cn_out_ref[...] = c_n
    hnb_out_ref[...] = h_n[:, :Hc].astype(jnp.bfloat16)


def _proj_kernel(hnb_ref, wout_ref, bout_ref, logits_ref):
    logits_ref[...] = (
        jnp.dot(hnb_ref[...], wout_ref[...], preferred_element_type=jnp.float32)
        + bout_ref[...]
    )


def _forward_split(idx_p, h0_p, c0_p, kp, Bp):
    Hp, Hc, Vp, TN = kp["hidden_pad"], kp["hidden_ctr"], kp["vocab_pad"], kp["tile_n"]

    # ---- call 1: one-step LSTM (cheap, single block) ------------------------
    hn_p, cn_p, hnb = pl.pallas_call(
        functools.partial(_lstm_step_kernel, B=Bp, Hp=Hp, Hc=Hc),
        grid_spec=pltpu.PrefetchScalarGridSpec(
            num_scalar_prefetch=1,
            grid=(1,),
            in_specs=[
                pl.BlockSpec(memory_space=pl.ANY),                  # E' in HBM
                pl.BlockSpec((Hp, 4 * Hp), lambda i, ids: (0, 0)),
                pl.BlockSpec((1, 4 * Hp), lambda i, ids: (0, 0)),
                pl.BlockSpec((Bp, Hp), lambda i, ids: (0, 0)),
                pl.BlockSpec((Bp, Hp), lambda i, ids: (0, 0)),
            ],
            out_specs=[
                pl.BlockSpec((Bp, Hp), lambda i, ids: (0, 0)),
                pl.BlockSpec((Bp, Hp), lambda i, ids: (0, 0)),
                pl.BlockSpec((Bp, Hc), lambda i, ids: (0, 0)),
            ],
            scratch_shapes=[
                pltpu.VMEM((Bp, 4 * Hp), jnp.float32),
                pltpu.SemaphoreType.DMA((Bp,)),
            ],
        ),
        out_shape=[
            jax.ShapeDtypeStruct((Bp, Hp), jnp.float32),
            jax.ShapeDtypeStruct((Bp, Hp), jnp.float32),
            jax.ShapeDtypeStruct((Bp, Hc), jnp.bfloat16),
        ],
        compiler_params=pltpu.CompilerParams(
            dimension_semantics=("arbitrary",),
            vmem_limit_bytes=_VMEM_LIMIT,
        ),
    )(idx_p, kp["e4"], kp["whh"], kp["b_gates"], h0_p, c0_p)

    # ---- call 2: V-tiled projection, shards across TensorCores -------------
    logits_p = pl.pallas_call(
        _proj_kernel,
        grid_spec=pltpu.PrefetchScalarGridSpec(
            num_scalar_prefetch=0,
            grid=(Vp // TN,),
            in_specs=[
                pl.BlockSpec((Bp, Hc), lambda j: (0, 0)),           # h_n (bf16)
                pl.BlockSpec((Hc, TN), lambda j: (0, j)),           # W_out^T tile
                pl.BlockSpec((1, TN), lambda j: (0, j)),            # b_out tile
            ],
            out_specs=pl.BlockSpec((Bp, TN), lambda j: (0, j)),
        ),
        out_shape=jax.ShapeDtypeStruct((Bp, Vp), jnp.float32),
        compiler_params=pltpu.CompilerParams(
            dimension_semantics=("parallel",),
            vmem_limit_bytes=_VMEM_LIMIT,
        ),
    )(hnb, kp["wout"], kp["b_out"])

    return logits_p, hn_p, cn_p


# ---------------------------------------------------------------------------
# Public wrapper: Decoder.forward
# ---------------------------------------------------------------------------
def decoder_forward(input_seq, h_0, c_0, kp, split_projection=None):
    """Pallas equivalent of Decoder.forward.

    Args:
      input_seq: (B,) int token ids.
      h_0, c_0:  (1, B, H) f32 (n_layers = 1).
      kp:        packed/padded kernel params (see _init_params).
      split_projection: None -> auto (split on multi-TensorCore chips, v7x).
    Returns:
      (output (B, V), h_n (1, B, H), c_n (1, B, H))
    """
    if split_projection is None:
        split_projection = _has_multiple_tensorcores()

    V, H = kp["vocab"], kp["hidden"]
    Hp = kp["hidden_pad"]
    road_pad = kp["road_pad"]
    B = int(input_seq.shape[0])
    Bp = _round_up(B, 8)

    # Batch-pad ids with road_pad (a valid, zeroed embedding row) and clip so
    # every gathered row is well defined.
    idx_p = jnp.full((Bp,), road_pad, jnp.int32).at[:B].set(
        jnp.clip(input_seq.astype(jnp.int32), 0, V - 1))
    h0_p = jnp.zeros((Bp, Hp), jnp.float32).at[:B, :H].set(h_0.reshape(B, H))
    c0_p = jnp.zeros((Bp, Hp), jnp.float32).at[:B, :H].set(c_0.reshape(B, H))

    if split_projection:
        logits_p, hn_p, cn_p = _forward_split(idx_p, h0_p, c0_p, kp, Bp)
    else:
        logits_p, hn_p, cn_p = _forward_fused(idx_p, h0_p, c0_p, kp, Bp)

    logits = logits_p[:B, :V]
    h_n = hn_p[:B, :H].reshape(1, B, H)
    c_n = cn_p[:B, :H].reshape(1, B, H)
    return logits, h_n, c_n


# ---------------------------------------------------------------------------
# Parameter init: PyTorch-shaped f32 weights + packed/padded kernel params
# ---------------------------------------------------------------------------
def _init_params(key, input_size, hidden_size, z_size, road_pad=0, tile_n=512):
    V, H, Z = input_size, hidden_size, z_size
    Hp = _round_up(H, 128)            # lane-aligned hidden dim (gate slabs)
    Hc = _round_up(H, 16)             # un-padded contraction dim for W_out (bf16 sublane)
    Vp = _round_up(V, tile_n)         # lane-dense, tileable vocab dim
    Ve = _round_up(V, 8)              # E' row padding (never gathered; ids < V)
    ks = jax.random.split(key, 11)
    k = 1.0 / np.sqrt(H)

    emb = jax.random.normal(ks[0], (V, H), jnp.float32)
    emb = emb.at[road_pad].set(0.0)   # padding_idx

    w_ih = jax.random.uniform(ks[1], (4 * H, H), jnp.float32, -k, k)
    w_hh = jax.random.uniform(ks[2], (4 * H, H), jnp.float32, -k, k)
    b_ih = jax.random.uniform(ks[3], (4 * H,), jnp.float32, -k, k)
    b_hh = jax.random.uniform(ks[4], (4 * H,), jnp.float32, -k, k)

    w_out = jax.random.uniform(ks[5], (V, H), jnp.float32, -k, k)
    b_out = jax.random.uniform(ks[6], (V,), jnp.float32, -k, k)

    kz = 1.0 / np.sqrt(Z)
    w_h0 = jax.random.uniform(ks[7], (H, Z), jnp.float32, -kz, kz)
    b_h0 = jax.random.uniform(ks[8], (H,), jnp.float32, -kz, kz)
    w_c0 = jax.random.uniform(ks[9], (H, Z), jnp.float32, -kz, kz)
    b_c0 = jax.random.uniform(ks[10], (H,), jnp.float32, -kz, kz)

    # ---- kernel-side packed / padded params --------------------------------
    # Fold the embedding and input projection offline: E' = emb @ W_ih^T,
    # gate-blocked so each gate lives in its own lane-aligned Hp-wide slab.
    e4 = jnp.dot(emb, w_ih.T, precision=jax.lax.Precision.HIGHEST).reshape(V, 4, H)
    e4_p = jnp.zeros((Ve, 4, Hp), jnp.float32).at[:V, :, :H].set(e4)
    e4_p = e4_p.reshape(Ve, 4 * Hp)

    whh = w_hh.T.reshape(H, 4, H)
    whh_p = jnp.zeros((Hp, 4, Hp), jnp.float32).at[:H, :, :H].set(whh)
    whh_p = whh_p.reshape(Hp, 4 * Hp)

    bg = (b_ih + b_hh).reshape(4, H)
    bg_p = jnp.zeros((4, Hp), jnp.float32).at[:, :H].set(bg).reshape(1, 4 * Hp)

    # W_out^T with UN-padded contraction dim (Hc ~= H), bf16 streamed slab.
    wout_p = jnp.zeros((Hc, Vp), jnp.float32).at[:H, :V].set(w_out.T)
    wout_p = wout_p.astype(jnp.bfloat16)
    bout_p = jnp.zeros((1, Vp), jnp.float32).at[0, :V].set(b_out)

    kernel_params = dict(
        e4=e4_p, whh=whh_p, b_gates=bg_p, wout=wout_p, b_out=bout_p,
        vocab=V, hidden=H, hidden_pad=Hp, hidden_ctr=Hc,
        vocab_pad=Vp, tile_n=tile_n, road_pad=road_pad,
    )
    ref_params = dict(
        embedding=emb, w_ih=w_ih, w_hh=w_hh, b_gates=b_ih + b_hh,
        w_out=w_out, b_out=b_out,
    )
    glue = dict(w_h0=w_h0, b_h0=b_h0, w_c0=w_c0, b_c0=b_c0)
    return kernel_params, ref_params, glue


# Pure-JAX reference (PyTorch semantics) for a sanity check.
def _reference_forward(input_seq, h_0, c_0, rp):
    hi = jax.lax.Precision.HIGHEST
    emb = rp["embedding"]
    H = emb.shape[1]
    x = emb[input_seq]
    h0, c0 = h_0[0], c_0[0]
    gates = (jnp.dot(x, rp["w_ih"].T, precision=hi)
             + jnp.dot(h0, rp["w_hh"].T, precision=hi)
             + rp["b_gates"])
    i = jax.nn.sigmoid(gates[:, :H])
    f = jax.nn.sigmoid(gates[:, H:2 * H])
    g = jnp.tanh(gates[:, 2 * H:3 * H])
    o = jax.nn.sigmoid(gates[:, 3 * H:])
    c_n = f * c0 + i * g
    h_n = o * jnp.tanh(c_n)
    out = jnp.dot(h_n, rp["w_out"].T, precision=hi) + rp["b_out"]
    return out, h_n[None], c_n[None]


if __name__ == "__main__":
    # Small shapes consistent with the module.
    B = 8       # batch
    V = 1200    # input_size (vocabulary / road segments) -> Vp=1536, 3 V-tiles
    H = 32      # hidden_size
    Z = 16      # z_size
    N_LAYERS = 1

    key = jax.random.PRNGKey(0)
    kparam, kz, ki = jax.random.split(key, 3)

    kp, rp, glue = _init_params(kparam, V, H, Z, road_pad=0)

    # Glue: build h_0 / c_0 from a latent z via decode_h0 / decode_c0 linears.
    z = jax.random.normal(kz, (B, Z), jnp.float32)
    h_0 = (z @ glue["w_h0"].T + glue["b_h0"]).reshape(N_LAYERS, B, H)
    c_0 = (z @ glue["w_c0"].T + glue["b_c0"]).reshape(N_LAYERS, B, H)

    input_seq = jax.random.randint(ki, (B,), 0, V, dtype=jnp.int32)

    ref_out, ref_h, ref_c = _reference_forward(input_seq, h_0, c_0, rp)

    # Exercise both structures: fused (v5e/v6e default) and split (v7x default).
    for split in (False, True):
        out, h_n, c_n = decoder_forward(input_seq, h_0, c_0, kp,
                                        split_projection=split)
        jax.block_until_ready((out, h_n, c_n))
        # Looser tolerance on logits: W_out^T and h_n are bf16 on the MXU path.
        np.testing.assert_allclose(np.asarray(out), np.asarray(ref_out),
                                   rtol=2e-2, atol=2e-2)
        np.testing.assert_allclose(np.asarray(h_n), np.asarray(ref_h),
                                   rtol=1e-2, atol=1e-2)
        np.testing.assert_allclose(np.asarray(c_n), np.asarray(ref_c),
                                   rtol=1e-2, atol=1e-2)

    print("KERNEL_OK")
</pallas_src>

<mosaic_0001>
module attributes {stable_mosaic.version = 11 : i64} {
  func.func @_decoder_fused_kernel(%arg0: i32, %arg1: memref<8xi32, #tpu.memory_space<smem>>, %arg2: memref<1200x512xf32, #tpu.memory_space<any>>, %arg3: memref<128x512xf32, #tpu.memory_space<vmem>>, %arg4: memref<1x512xf32, #tpu.memory_space<vmem>>, %arg5: memref<32x512xbf16, #tpu.memory_space<vmem>>, %arg6: memref<1x512xf32, #tpu.memory_space<vmem>>, %arg7: memref<8x128xf32, #tpu.memory_space<vmem>>, %arg8: memref<8x128xf32, #tpu.memory_space<vmem>>, %arg9: memref<8x512xf32, #tpu.memory_space<vmem>>, %arg10: memref<8x128xf32, #tpu.memory_space<vmem>>, %arg11: memref<8x128xf32, #tpu.memory_space<vmem>>, %arg12: memref<8x512xf32, #tpu.memory_space<vmem>>, %arg13: memref<8x32xbf16, #tpu.memory_space<vmem>>, %arg14: memref<8x!tpu.dma_semaphore, #tpu.memory_space<semaphore_mem>>) attributes {dimension_semantics = [#tpu.dimension_semantics<arbitrary>], iteration_bounds = array<i64: 3>, scalar_prefetch = 1 : i64, scratch_operands = 3 : i64, tpu.core_type = #tpu.core_type<tc>, window_params = [{}, {pipeline_mode = #tpu.pipeline_mode<synchronous>, transform_indices = @transform_1, window_bounds = array<i64: 128, 512>}, {pipeline_mode = #tpu.pipeline_mode<synchronous>, transform_indices = @transform_2, window_bounds = array<i64: 1, 512>}, {transform_indices = @transform_3, window_bounds = array<i64: 32, 512>}, {transform_indices = @transform_4, window_bounds = array<i64: 1, 512>}, {pipeline_mode = #tpu.pipeline_mode<synchronous>, transform_indices = @transform_5, window_bounds = array<i64: 8, 128>}, {pipeline_mode = #tpu.pipeline_mode<synchronous>, transform_indices = @transform_6, window_bounds = array<i64: 8, 128>}, {transform_indices = @transform_7, window_bounds = array<i64: 8, 512>}, {pipeline_mode = #tpu.pipeline_mode<synchronous>, transform_indices = @transform_8, window_bounds = array<i64: 8, 128>}, {pipeline_mode = #tpu.pipeline_mode<synchronous>, transform_indices = @transform_9, window_bounds = array<i64: 8, 128>}]} {
    %c0_i32 = arith.constant 0 : i32
    %0 = arith.cmpi eq, %arg0, %c0_i32 : i32
    %1 = arith.extui %0 : i1 to i32
    %c0_i32_0 = arith.constant 0 : i32
    %2 = arith.cmpi ne, %1, %c0_i32_0 : i32
    scf.if %2 {
      %c0_8 = arith.constant 0 : index
      %10 = memref.load %arg1[%c0_8] : memref<8xi32, #tpu.memory_space<smem>>
      %c0_i32_9 = arith.constant 0 : i32
      %c0_i32_10 = arith.constant 0 : i32
      %c0_i32_11 = arith.constant 0 : i32
      %11 = tpu.memref_slice %arg2[%10, %c0_i32_11] : memref<1200x512xf32, #tpu.memory_space<any>> -> memref<1x512xf32, #tpu.memory_space<any>>
      %12 = tpu.memref_squeeze %11 : memref<1x512xf32, #tpu.memory_space<any>> -> memref<512xf32, #tpu.memory_space<any>>
      %c0_i32_12 = arith.constant 0 : i32
      %13 = tpu.memref_slice %arg12[%c0_i32_9, %c0_i32_12] : memref<8x512xf32, #tpu.memory_space<vmem>> -> memref<1x512xf32, #tpu.memory_space<vmem>>
      %14 = tpu.memref_squeeze %13 : memref<1x512xf32, #tpu.memory_space<vmem>> -> memref<512xf32, #tpu.memory_space<vmem>>
      %15 = tpu.memref_slice %arg14[%c0_i32_10] : memref<8x!tpu.dma_semaphore, #tpu.memory_space<semaphore_mem>> -> memref<1x!tpu.dma_semaphore, #tpu.memory_space<semaphore_mem>>
      %16 = tpu.memref_squeeze %15 : memref<1x!tpu.dma_semaphore, #tpu.memory_space<semaphore_mem>> -> memref<!tpu.dma_semaphore, #tpu.memory_space<semaphore_mem>>
      tpu.enqueue_dma source(%12 : memref<512xf32, #tpu.memory_space<any>>) target(%14 : memref<512xf32, #tpu.memory_space<vmem>>) target_semaphore(%16 : memref<!tpu.dma_semaphore, #tpu.memory_space<semaphore_mem>>)
      %c1 = arith.constant 1 : index
      %17 = memref.load %arg1[%c1] : memref<8xi32, #tpu.memory_space<smem>>
      %c1_i32 = arith.constant 1 : i32
      %c1_i32_13 = arith.constant 1 : i32
      %c0_i32_14 = arith.constant 0 : i32
      %18 = tpu.memref_slice %arg2[%17, %c0_i32_14] : memref<1200x512xf32, #tpu.memory_space<any>> -> memref<1x512xf32, #tpu.memory_space<any>>
      %19 = tpu.memref_squeeze %18 : memref<1x512xf32, #tpu.memory_space<any>> -> memref<512xf32, #tpu.memory_space<any>>
      %c0_i32_15 = arith.constant 0 : i32
      %20 = tpu.memref_slice %arg12[%c1_i32, %c0_i32_15] : memref<8x512xf32, #tpu.memory_space<vmem>> -> memref<1x512xf32, #tpu.memory_space<vmem>>
      %21 = tpu.memref_squeeze %20 : memref<1x512xf32, #tpu.memory_space<vmem>> -> memref<512xf32, #tpu.memory_space<vmem>>
      %22 = tpu.memref_slice %arg14[%c1_i32_13] : memref<8x!tpu.dma_semaphore, #tpu.memory_space<semaphore_mem>> -> memref<1x!tpu.dma_semaphore, #tpu.memory_space<semaphore_mem>>
      %23 = tpu.memref_squeeze %22 : memref<1x!tpu.dma_semaphore, #tpu.memory_space<semaphore_mem>> -> memref<!tpu.dma_semaphore, #tpu.memory_space<semaphore_mem>>
      tpu.enqueue_dma source(%19 : memref<512xf32, #tpu.memory_space<any>>) target(%21 : memref<512xf32, #tpu.memory_space<vmem>>) target_semaphore(%23 : memref<!tpu.dma_semaphore, #tpu.memory_space<semaphore_mem>>)
      %c2 = arith.constant 2 : index
      %24 = memref.load %arg1[%c2] : memref<8xi32, #tpu.memory_space<smem>>
      %c2_i32 = arith.constant 2 : i32
      %c2_i32_16 = arith.constant 2 : i32
      %c0_i32_17 = arith.constant 0 : i32
      %25 = tpu.memref_slice %arg2[%24, %c0_i32_17] : memref<1200x512xf32, #tpu.memory_space<any>> -> memref<1x512xf32, #tpu.memory_space<any>>
      %26 = tpu.memref_squeeze %25 : memref<1x512xf32, #tpu.memory_space<any>> -> memref<512xf32, #tpu.memory_space<any>>
      %c0_i32_18 = arith.constant 0 : i32
      %27 = tpu.memref_slice %arg12[%c2_i32, %c0_i32_18] : memref<8x512xf32, #tpu.memory_space<vmem>> -> memref<1x512xf32, #tpu.memory_space<vmem>>
      %28 = tpu.memref_squeeze %27 : memref<1x512xf32, #tpu.memory_space<vmem>> -> memref<512xf32, #tpu.memory_space<vmem>>
      %29 = tpu.memref_slice %arg14[%c2_i32_16] : memref<8x!tpu.dma_semaphore, #tpu.memory_space<semaphore_mem>> -> memref<1x!tpu.dma_semaphore, #tpu.memory_space<semaphore_mem>>
      %30 = tpu.memref_squeeze %29 : memref<1x!tpu.dma_semaphore, #tpu.memory_space<semaphore_mem>> -> memref<!tpu.dma_semaphore, #tpu.memory_space<semaphore_mem>>
      tpu.enqueue_dma source(%26 : memref<512xf32, #tpu.memory_space<any>>) target(%28 : memref<512xf32, #tpu.memory_space<vmem>>) target_semaphore(%30 : memref<!tpu.dma_semaphore, #tpu.memory_space<semaphore_mem>>)
      %c3 = arith.constant 3 : index
      %31 = memref.load %arg1[%c3] : memref<8xi32, #tpu.memory_space<smem>>
      %c3_i32 = arith.constant 3 : i32
      %c3_i32_19 = arith.constant 3 : i32
      %c0_i32_20 = arith.constant 0 : i32
      %32 = tpu.memref_slice %arg2[%31, %c0_i32_20] : memref<1200x512xf32, #tpu.memory_space<any>> -> memref<1x512xf32, #tpu.memory_space<any>>
      %33 = tpu.memref_squeeze %32 : memref<1x512xf32, #tpu.memory_space<any>> -> memref<512xf32, #tpu.memory_space<any>>
      %c0_i32_21 = arith.constant 0 : i32
      %34 = tpu.memref_slice %arg12[%c3_i32, %c0_i32_21] : memref<8x512xf32, #tpu.memory_space<vmem>> -> memref<1x512xf32, #tpu.memory_space<vmem>>
      %35 = tpu.memref_squeeze %34 : memref<1x512xf32, #tpu.memory_space<vmem>> -> memref<512xf32, #tpu.memory_space<vmem>>
      %36 = tpu.memref_slice %arg14[%c3_i32_19] : memref<8x!tpu.dma_semaphore, #tpu.memory_space<semaphore_mem>> -> memref<1x!tpu.dma_semaphore, #tpu.memory_space<semaphore_mem>>
      %37 = tpu.memref_squeeze %36 : memref<1x!tpu.dma_semaphore, #tpu.memory_space<semaphore_mem>> -> memref<!tpu.dma_semaphore, #tpu.memory_space<semaphore_mem>>
      tpu.enqueue_dma source(%33 : memref<512xf32, #tpu.memory_space<any>>) target(%35 : memref<512xf32, #tpu.memory_space<vmem>>) target_semaphore(%37 : memref<!tpu.dma_semaphore, #tpu.memory_space<semaphore_mem>>)
      %c4 = arith.constant 4 : index
      %38 = memref.load %arg1[%c4] : memref<8xi32, #tpu.memory_space<smem>>
      %c4_i32 = arith.constant 4 : i32
      %c4_i32_22 = arith.constant 4 : i32
      %c0_i32_23 = arith.constant 0 : i32
      %39 = tpu.memref_slice %arg2[%38, %c0_i32_23] : memref<1200x512xf32, #tpu.memory_space<any>> -> memref<1x512xf32, #tpu.memory_space<any>>
      %40 = tpu.memref_squeeze %39 : memref<1x512xf32, #tpu.memory_space<any>> -> memref<512xf32, #tpu.memory_space<any>>
      %c0_i32_24 = arith.constant 0 : i32
      %41 = tpu.memref_slice %arg12[%c4_i32, %c0_i32_24] : memref<8x512xf32, #tpu.memory_space<vmem>> -> memref<1x512xf32, #tpu.memory_space<vmem>>
      %42 = tpu.memref_squeeze %41 : memref<1x512xf32, #tpu.memory_space<vmem>> -> memref<512xf32, #tpu.memory_space<vmem>>
      %43 = tpu.memref_slice %arg14[%c4_i32_22] : memref<8x!tpu.dma_semaphore, #tpu.memory_space<semaphore_mem>> -> memref<1x!tpu.dma_semaphore, #tpu.memory_space<semaphore_mem>>
      %44 = tpu.memref_squeeze %43 : memref<1x!tpu.dma_semaphore, #tpu.memory_space<semaphore_mem>> -> memref<!tpu.dma_semaphore, #tpu.memory_space<semaphore_mem>>
      tpu.enqueue_dma source(%40 : memref<512xf32, #tpu.memory_space<any>>) target(%42 : memref<512xf32, #tpu.memory_space<vmem>>) target_semaphore(%44 : memref<!tpu.dma_semaphore, #tpu.memory_space<semaphore_mem>>)
      %c5 = arith.constant 5 : index
      %45 = memref.load %arg1[%c5] : memref<8xi32, #tpu.memory_space<smem>>
      %c5_i32 = arith.constant 5 : i32
      %c5_i32_25 = arith.constant 5 : i32
      %c0_i32_26 = arith.constant 0 : i32
      %46 = tpu.memref_slice %arg2[%45, %c0_i32_26] : memref<1200x512xf32, #tpu.memory_space<any>> -> memref<1x512xf32, #tpu.memory_space<any>>
      %47 = tpu.memref_squeeze %46 : memref<1x512xf32, #tpu.memory_space<any>> -> memref<512xf32, #tpu.memory_space<any>>
      %c0_i32_27 = arith.constant 0 : i32
      %48 = tpu.memref_slice %arg12[%c5_i32, %c0_i32_27] : memref<8x512xf32, #tpu.memory_space<vmem>> -> memref<1x512xf32, #tpu.memory_space<vmem>>
      %49 = tpu.memref_squeeze %48 : memref<1x512xf32, #tpu.memory_space<vmem>> -> memref<512xf32, #tpu.memory_space<vmem>>
      %50 = tpu.memref_slice %arg14[%c5_i32_25] : memref<8x!tpu.dma_semaphore, #tpu.memory_space<semaphore_mem>> -> memref<1x!tpu.dma_semaphore, #tpu.memory_space<semaphore_mem>>
      %51 = tpu.memref_squeeze %50 : memref<1x!tpu.dma_semaphore, #tpu.memory_space<semaphore_mem>> -> memref<!tpu.dma_semaphore, #tpu.memory_space<semaphore_mem>>
      tpu.enqueue_dma source(%47 : memref<512xf32, #tpu.memory_space<any>>) target(%49 : memref<512xf32, #tpu.memory_space<vmem>>) target_semaphore(%51 : memref<!tpu.dma_semaphore, #tpu.memory_space<semaphore_mem>>)
      %c6 = arith.constant 6 : index
      %52 = memref.load %arg1[%c6] : memref<8xi32, #tpu.memory_space<smem>>
      %c6_i32 = arith.constant 6 : i32
      %c6_i32_28 = arith.constant 6 : i32
      %c0_i32_29 = arith.constant 0 : i32
      %53 = tpu.memref_slice %arg2[%52, %c0_i32_29] : memref<1200x512xf32, #tpu.memory_space<any>> -> memref<1x512xf32, #tpu.memory_space<any>>
      %54 = tpu.memref_squeeze %53 : memref<1x512xf32, #tpu.memory_space<any>> -> memref<512xf32, #tpu.memory_space<any>>
      %c0_i32_30 = arith.constant 0 : i32
      %55 = tpu.memref_slice %arg12[%c6_i32, %c0_i32_30] : memref<8x512xf32, #tpu.memory_space<vmem>> -> memref<1x512xf32, #tpu.memory_space<vmem>>
      %56 = tpu.memref_squeeze %55 : memref<1x512xf32, #tpu.memory_space<vmem>> -> memref<512xf32, #tpu.memory_space<vmem>>
      %57 = tpu.memref_slice %arg14[%c6_i32_28] : memref<8x!tpu.dma_semaphore, #tpu.memory_space<semaphore_mem>> -> memref<1x!tpu.dma_semaphore, #tpu.memory_space<semaphore_mem>>
      %58 = tpu.memref_squeeze %57 : memref<1x!tpu.dma_semaphore, #tpu.memory_space<semaphore_mem>> -> memref<!tpu.dma_semaphore, #tpu.memory_space<semaphore_mem>>
      tpu.enqueue_dma source(%54 : memref<512xf32, #tpu.memory_space<any>>) target(%56 : memref<512xf32, #tpu.memory_space<vmem>>) target_semaphore(%58 : memref<!tpu.dma_semaphore, #tpu.memory_space<semaphore_mem>>)
      %c7 = arith.constant 7 : index
      %59 = memref.load %arg1[%c7] : memref<8xi32, #tpu.memory_space<smem>>
      %c7_i32 = arith.constant 7 : i32
      %c7_i32_31 = arith.constant 7 : i32
      %c0_i32_32 = arith.constant 0 : i32
      %60 = tpu.memref_slice %arg2[%59, %c0_i32_32] : memref<1200x512xf32, #tpu.memory_space<any>> -> memref<1x512xf32, #tpu.memory_space<any>>
      %61 = tpu.memref_squeeze %60 : memref<1x512xf32, #tpu.memory_space<any>> -> memref<512xf32, #tpu.memory_space<any>>
      %c0_i32_33 = arith.constant 0 : i32
      %62 = tpu.memref_slice %arg12[%c7_i32, %c0_i32_33] : memref<8x512xf32, #tpu.memory_space<vmem>> -> memref<1x512xf32, #tpu.memory_space<vmem>>
      %63 = tpu.memref_squeeze %62 : memref<1x512xf32, #tpu.memory_space<vmem>> -> memref<512xf32, #tpu.memory_space<vmem>>
      %64 = tpu.memref_slice %arg14[%c7_i32_31] : memref<8x!tpu.dma_semaphore, #tpu.memory_space<semaphore_mem>> -> memref<1x!tpu.dma_semaphore, #tpu.memory_space<semaphore_mem>>
      %65 = tpu.memref_squeeze %64 : memref<1x!tpu.dma_semaphore, #tpu.memory_space<semaphore_mem>> -> memref<!tpu.dma_semaphore, #tpu.memory_space<semaphore_mem>>
      tpu.enqueue_dma source(%61 : memref<512xf32, #tpu.memory_space<any>>) target(%63 : memref<512xf32, #tpu.memory_space<vmem>>) target_semaphore(%65 : memref<!tpu.dma_semaphore, #tpu.memory_space<semaphore_mem>>)
      %c0_34 = arith.constant 0 : index
      %66 = memref.load %arg1[%c0_34] : memref<8xi32, #tpu.memory_space<smem>>
      %c0_i32_35 = arith.constant 0 : i32
      %c0_i32_36 = arith.constant 0 : i32
      %c0_i32_37 = arith.constant 0 : i32
      %67 = tpu.memref_slice %arg2[%66, %c0_i32_37] : memref<1200x512xf32, #tpu.memory_space<any>> -> memref<1x512xf32, #tpu.memory_space<any>>
      %68 = tpu.memref_squeeze %67 : memref<1x512xf32, #tpu.memory_space<any>> -> memref<512xf32, #tpu.memory_space<any>>
      %c0_i32_38 = arith.constant 0 : i32
      %69 = tpu.memref_slice %arg12[%c0_i32_35, %c0_i32_38] : memref<8x512xf32, #tpu.memory_space<vmem>> -> memref<1x512xf32, #tpu.memory_space<vmem>>
      %70 = tpu.memref_squeeze %69 : memref<1x512xf32, #tpu.memory_space<vmem>> -> memref<512xf32, #tpu.memory_space<vmem>>
      %71 = tpu.memref_slice %arg14[%c0_i32_36] : memref<8x!tpu.dma_semaphore, #tpu.memory_space<semaphore_mem>> -> memref<1x!tpu.dma_semaphore, #tpu.memory_space<semaphore_mem>>
      %72 = tpu.memref_squeeze %71 : memref<1x!tpu.dma_semaphore, #tpu.memory_space<semaphore_mem>> -> memref<!tpu.dma_semaphore, #tpu.memory_space<semaphore_mem>>
      tpu.wait_dma2 semaphore(%72 : memref<!tpu.dma_semaphore, #tpu.memory_space<semaphore_mem>>) src(%68 : memref<512xf32, #tpu.memory_space<any>>) dst(%70 : memref<512xf32, #tpu.memory_space<vmem>>)
      %c1_39 = arith.constant 1 : index
      %73 = memref.load %arg1[%c1_39] : memref<8xi32, #tpu.memory_space<smem>>
      %c1_i32_40 = arith.constant 1 : i32
      %c1_i32_41 = arith.constant 1 : i32
      %c0_i32_42 = arith.constant 0 : i32
      %74 = tpu.memref_slice %arg2[%73, %c0_i32_42] : memref<1200x512xf32, #tpu.memory_space<any>> -> memref<1x512xf32, #tpu.memory_space<any>>
      %75 = tpu.memref_squeeze %74 : memref<1x512xf32, #tpu.memory_space<any>> -> memref<512xf32, #tpu.memory_space<any>>
      %c0_i32_43 = arith.constant 0 : i32
      %76 = tpu.memref_slice %arg12[%c1_i32_40, %c0_i32_43] : memref<8x512xf32, #tpu.memory_space<vmem>> -> memref<1x512xf32, #tpu.memory_space<vmem>>
      %77 = tpu.memref_squeeze %76 : memref<1x512xf32, #tpu.memory_space<vmem>> -> memref<512xf32, #tpu.memory_space<vmem>>
      %78 = tpu.memref_slice %arg14[%c1_i32_41] : memref<8x!tpu.dma_semaphore, #tpu.memory_space<semaphore_mem>> -> memref<1x!tpu.dma_semaphore, #tpu.memory_space<semaphore_mem>>
      %79 = tpu.memref_squeeze %78 : memref<1x!tpu.dma_semaphore, #tpu.memory_space<semaphore_mem>> -> memref<!tpu.dma_semaphore, #tpu.memory_space<semaphore_mem>>
      tpu.wait_dma2 semaphore(%79 : memref<!tpu.dma_semaphore, #tpu.memory_space<semaphore_mem>>) src(%75 : memref<512xf32, #tpu.memory_space<any>>) dst(%77 : memref<512xf32, #tpu.memory_space<vmem>>)
      %c2_44 = arith.constant 2 : index
      %80 = memref.load %arg1[%c2_44] : memref<8xi32, #tpu.memory_space<smem>>
      %c2_i32_45 = arith.constant 2 : i32
      %c2_i32_46 = arith.constant 2 : i32
      %c0_i32_47 = arith.constant 0 : i32
      %81 = tpu.memref_slice %arg2[%80, %c0_i32_47] : memref<1200x512xf32, #tpu.memory_space<any>> -> memref<1x512xf32, #tpu.memory_space<any>>
      %82 = tpu.memref_squeeze %81 : memref<1x512xf32, #tpu.memory_space<any>> -> memref<512xf32, #tpu.memory_space<any>>
      %c0_i32_48 = arith.constant 0 : i32
      %83 = tpu.memref_slice %arg12[%c2_i32_45, %c0_i32_48] : memref<8x512xf32, #tpu.memory_space<vmem>> -> memref<1x512xf32, #tpu.memory_space<vmem>>
      %84 = tpu.memref_squeeze %83 : memref<1x512xf32, #tpu.memory_space<vmem>> -> memref<512xf32, #tpu.memory_space<vmem>>
      %85 = tpu.memref_slice %arg14[%c2_i32_46] : memref<8x!tpu.dma_semaphore, #tpu.memory_space<semaphore_mem>> -> memref<1x!tpu.dma_semaphore, #tpu.memory_space<semaphore_mem>>
      %86 = tpu.memref_squeeze %85 : memref<1x!tpu.dma_semaphore, #tpu.memory_space<semaphore_mem>> -> memref<!tpu.dma_semaphore, #tpu.memory_space<semaphore_mem>>
      tpu.wait_dma2 semaphore(%86 : memref<!tpu.dma_semaphore, #tpu.memory_space<semaphore_mem>>) src(%82 : memref<512xf32, #tpu.memory_space<any>>) dst(%84 : memref<512xf32, #tpu.memory_space<vmem>>)
      %c3_49 = arith.constant 3 : index
      %87 = memref.load %arg1[%c3_49] : memref<8xi32, #tpu.memory_space<smem>>
      %c3_i32_50 = arith.constant 3 : i32
      %c3_i32_51 = arith.constant 3 : i32
      %c0_i32_52 = arith.constant 0 : i32
      %88 = tpu.memref_slice %arg2[%87, %c0_i32_52] : memref<1200x512xf32, #tpu.memory_space<any>> -> memref<1x512xf32, #tpu.memory_space<any>>
      %89 = tpu.memref_squeeze %88 : memref<1x512xf32, #tpu.memory_space<any>> -> memref<512xf32, #tpu.memory_space<any>>
      %c0_i32_53 = arith.constant 0 : i32
      %90 = tpu.memref_slice %arg12[%c3_i32_50, %c0_i32_53] : memref<8x512xf32, #tpu.memory_space<vmem>> -> memref<1x512xf32, #tpu.memory_space<vmem>>
      %91 = tpu.memref_squeeze %90 : memref<1x512xf32, #tpu.memory_space<vmem>> -> memref<512xf32, #tpu.memory_space<vmem>>
      %92 = tpu.memref_slice %arg14[%c3_i32_51] : memref<8x!tpu.dma_semaphore, #tpu.memory_space<semaphore_mem>> -> memref<1x!tpu.dma_semaphore, #tpu.memory_space<semaphore_mem>>
      %93 = tpu.memref_squeeze %92 : memref<1x!tpu.dma_semaphore, #tpu.memory_space<semaphore_mem>> -> memref<!tpu.dma_semaphore, #tpu.memory_space<semaphore_mem>>
      tpu.wait_dma2 semaphore(%93 : memref<!tpu.dma_semaphore, #tpu.memory_space<semaphore_mem>>) src(%89 : memref<512xf32, #tpu.memory_space<any>>) dst(%91 : memref<512xf32, #tpu.memory_space<vmem>>)
      %c4_54 = arith.constant 4 : index
      %94 = memref.load %arg1[%c4_54] : memref<8xi32, #tpu.memory_space<smem>>
      %c4_i32_55 = arith.constant 4 : i32
      %c4_i32_56 = arith.constant 4 : i32
      %c0_i32_57 = arith.constant 0 : i32
      %95 = tpu.memref_slice %arg2[%94, %c0_i32_57] : memref<1200x512xf32, #tpu.memory_space<any>> -> memref<1x512xf32, #tpu.memory_space<any>>
      %96 = tpu.memref_squeeze %95 : memref<1x512xf32, #tpu.memory_space<any>> -> memref<512xf32, #tpu.memory_space<any>>
      %c0_i32_58 = arith.constant 0 : i32
      %97 = tpu.memref_slice %arg12[%c4_i32_55, %c0_i32_58] : memref<8x512xf32, #tpu.memory_space<vmem>> -> memref<1x512xf32, #tpu.memory_space<vmem>>
      %98 = tpu.memref_squeeze %97 : memref<1x512xf32, #tpu.memory_space<vmem>> -> memref<512xf32, #tpu.memory_space<vmem>>
      %99 = tpu.memref_slice %arg14[%c4_i32_56] : memref<8x!tpu.dma_semaphore, #tpu.memory_space<semaphore_mem>> -> memref<1x!tpu.dma_semaphore, #tpu.memory_space<semaphore_mem>>
      %100 = tpu.memref_squeeze %99 : memref<1x!tpu.dma_semaphore, #tpu.memory_space<semaphore_mem>> -> memref<!tpu.dma_semaphore, #tpu.memory_space<semaphore_mem>>
      tpu.wait_dma2 semaphore(%100 : memref<!tpu.dma_semaphore, #tpu.memory_space<semaphore_mem>>) src(%96 : memref<512xf32, #tpu.memory_space<any>>) dst(%98 : memref<512xf32, #tpu.memory_space<vmem>>)
      %c5_59 = arith.constant 5 : index
      %101 = memref.load %arg1[%c5_59] : memref<8xi32, #tpu.memory_space<smem>>
      %c5_i32_60 = arith.constant 5 : i32
      %c5_i32_61 = arith.constant 5 : i32
      %c0_i32_62 = arith.constant 0 : i32
      %102 = tpu.memref_slice %arg2[%101, %c0_i32_62] : memref<1200x512xf32, #tpu.memory_space<any>> -> memref<1x512xf32, #tpu.memory_space<any>>
      %103 = tpu.memref_squeeze %102 : memref<1x512xf32, #tpu.memory_space<any>> -> memref<512xf32, #tpu.memory_space<any>>
      %c0_i32_63 = arith.constant 0 : i32
      %104 = tpu.memref_slice %arg12[%c5_i32_60, %c0_i32_63] : memref<8x512xf32, #tpu.memory_space<vmem>> -> memref<1x512xf32, #tpu.memory_space<vmem>>
      %105 = tpu.memref_squeeze %104 : memref<1x512xf32, #tpu.memory_space<vmem>> -> memref<512xf32, #tpu.memory_space<vmem>>
      %106 = tpu.memref_slice %arg14[%c5_i32_61] : memref<8x!tpu.dma_semaphore, #tpu.memory_space<semaphore_mem>> -> memref<1x!tpu.dma_semaphore, #tpu.memory_space<semaphore_mem>>
      %107 = tpu.memref_squeeze %106 : memref<1x!tpu.dma_semaphore, #tpu.memory_space<semaphore_mem>> -> memref<!tpu.dma_semaphore, #tpu.memory_space<semaphore_mem>>
      tpu.wait_dma2 semaphore(%107 : memref<!tpu.dma_semaphore, #tpu.memory_space<semaphore_mem>>) src(%103 : memref<512xf32, #tpu.memory_space<any>>) dst(%105 : memref<512xf32, #tpu.memory_space<vmem>>)
      %c6_64 = arith.constant 6 : index
      %108 = memref.load %arg1[%c6_64] : memref<8xi32, #tpu.memory_space<smem>>
      %c6_i32_65 = arith.constant 6 : i32
      %c6_i32_66 = arith.constant 6 : i32
      %c0_i32_67 = arith.constant 0 : i32
      %109 = tpu.memref_slice %arg2[%108, %c0_i32_67] : memref<1200x512xf32, #tpu.memory_space<any>> -> memref<1x512xf32, #tpu.memory_space<any>>
      %110 = tpu.memref_squeeze %109 : memref<1x512xf32, #tpu.memory_space<any>> -> memref<512xf32, #tpu.memory_space<any>>
      %c0_i32_68 = arith.constant 0 : i32
      %111 = tpu.memref_slice %arg12[%c6_i32_65, %c0_i32_68] : memref<8x512xf32, #tpu.memory_space<vmem>> -> memref<1x512xf32, #tpu.memory_space<vmem>>
      %112 = tpu.memref_squeeze %111 : memref<1x512xf32, #tpu.memory_space<vmem>> -> memref<512xf32, #tpu.memory_space<vmem>>
      %113 = tpu.memref_slice %arg14[%c6_i32_66] : memref<8x!tpu.dma_semaphore, #tpu.memory_space<semaphore_mem>> -> memref<1x!tpu.dma_semaphore, #tpu.memory_space<semaphore_mem>>
      %114 = tpu.memref_squeeze %113 : memref<1x!tpu.dma_semaphore, #tpu.memory_space<semaphore_mem>> -> memref<!tpu.dma_semaphore, #tpu.memory_space<semaphore_mem>>
      tpu.wait_dma2 semaphore(%114 : memref<!tpu.dma_semaphore, #tpu.memory_space<semaphore_mem>>) src(%110 : memref<512xf32, #tpu.memory_space<any>>) dst(%112 : memref<512xf32, #tpu.memory_space<vmem>>)
      %c7_69 = arith.constant 7 : index
      %115 = memref.load %arg1[%c7_69] : memref<8xi32, #tpu.memory_space<smem>>
      %c7_i32_70 = arith.constant 7 : i32
      %c7_i32_71 = arith.constant 7 : i32
      %c0_i32_72 = arith.constant 0 : i32
      %116 = tpu.memref_slice %arg2[%115, %c0_i32_72] : memref<1200x512xf32, #tpu.memory_space<any>> -> memref<1x512xf32, #tpu.memory_space<any>>
      %117 = tpu.memref_squeeze %116 : memref<1x512xf32, #tpu.memory_space<any>> -> memref<512xf32, #tpu.memory_space<any>>
      %c0_i32_73 = arith.constant 0 : i32
      %118 = tpu.memref_slice %arg12[%c7_i32_70, %c0_i32_73] : memref<8x512xf32, #tpu.memory_space<vmem>> -> memref<1x512xf32, #tpu.memory_space<vmem>>
      %119 = tpu.memref_squeeze %118 : memref<1x512xf32, #tpu.memory_space<vmem>> -> memref<512xf32, #tpu.memory_space<vmem>>
      %120 = tpu.memref_slice %arg14[%c7_i32_71] : memref<8x!tpu.dma_semaphore, #tpu.memory_space<semaphore_mem>> -> memref<1x!tpu.dma_semaphore, #tpu.memory_space<semaphore_mem>>
      %121 = tpu.memref_squeeze %120 : memref<1x!tpu.dma_semaphore, #tpu.memory_space<semaphore_mem>> -> memref<!tpu.dma_semaphore, #tpu.memory_space<semaphore_mem>>
      tpu.wait_dma2 semaphore(%121 : memref<!tpu.dma_semaphore, #tpu.memory_space<semaphore_mem>>) src(%117 : memref<512xf32, #tpu.memory_space<any>>) dst(%119 : memref<512xf32, #tpu.memory_space<vmem>>)
      %c0_74 = arith.constant 0 : index
      %c0_75 = arith.constant 0 : index
      %122 = vector.load %arg12[%c0_74, %c0_75] : memref<8x512xf32, #tpu.memory_space<vmem>>, vector<8x512xf32>
      %c0_76 = arith.constant 0 : index
      %c0_77 = arith.constant 0 : index
      %123 = vector.load %arg7[%c0_76, %c0_77] : memref<8x128xf32, #tpu.memory_space<vmem>>, vector<8x128xf32>
      %c0_78 = arith.constant 0 : index
      %c0_79 = arith.constant 0 : index
      %124 = vector.load %arg8[%c0_78, %c0_79] : memref<8x128xf32, #tpu.memory_space<vmem>>, vector<8x128xf32>
      %c0_80 = arith.constant 0 : index
      %c0_81 = arith.constant 0 : index
      %125 = vector.load %arg3[%c0_80, %c0_81] : memref<128x512xf32, #tpu.memory_space<vmem>>, vector<128x512xf32>
      %c0_82 = arith.constant 0 : index
      %c0_83 = arith.constant 0 : index
      %126 = vector.load %arg4[%c0_82, %c0_83] : memref<1x512xf32, #tpu.memory_space<vmem>>, vector<1x512xf32>
      %cst_84 = arith.constant dense<0.000000e+00> : vector<8x512xf32>
      %127 = tpu.matmul %123, %125, %cst_84 {dimension_numbers = #tpu.dot_dimension_numbers<[1], [0], [0], [1], [0, 0, 1, 1], [], []>} : vector<8x128xf32>, vector<128x512xf32>, vector<8x512xf32> -> vector<8x512xf32>
      %128 = arith.addf %122, %127 : vector<8x512xf32>
      %129 = vector.broadcast %126 : vector<1x512xf32> to vector<8x512xf32>
      %130 = arith.addf %128, %129 : vector<8x512xf32>
      %131 = vector.extract_strided_slice %130 {offsets = [0, 0], sizes = [8, 128], strides = [1, 1]} : vector<8x512xf32> to vector<8x128xf32>
      %132 = arith.negf %131 : vector<8x128xf32>
      %133 = math.exp %132 : vector<8x128xf32>
      %cst_85 = arith.constant 1.000000e+00 : f32
      %134 = vector.broadcast %cst_85 : f32 to vector<8x128xf32>
      %135 = arith.addf %134, %133 : vector<8x128xf32>
      %136 = arith.divf %134, %135 : vector<8x128xf32>
      %137 = vector.extract_strided_slice %130 {offsets = [0, 128], sizes = [8, 128], strides = [1, 1]} : vector<8x512xf32> to vector<8x128xf32>
      %138 = arith.negf %137 : vector<8x128xf32>
      %139 = math.exp %138 : vector<8x128xf32>
      %cst_86 = arith.constant 1.000000e+00 : f32
      %140 = vector.broadcast %cst_86 : f32 to vector<8x128xf32>
      %141 = arith.addf %140, %139 : vector<8x128xf32>
      %142 = arith.divf %140, %141 : vector<8x128xf32>
      %143 = vector.extract_strided_slice %130 {offsets = [0, 256], sizes = [8, 128], strides = [1, 1]} : vector<8x512xf32> to vector<8x128xf32>
      %144 = math.tanh %143 : vector<8x128xf32>
      %145 = vector.extract_strided_slice %130 {offsets = [0, 384], sizes = [8, 128], strides = [1, 1]} : vector<8x512xf32> to vector<8x128xf32>
      %146 = arith.negf %145 : vector<8x128xf32>
      %147 = math.exp %146 : vector<8x128xf32>
      %cst_87 = arith.constant 1.000000e+00 : f32
      %148 = vector.broadcast %cst_87 : f32 to vector<8x128xf32>
      %149 = arith.addf %148, %147 : vector<8x128xf32>
      %150 = arith.divf %148, %149 : vector<8x128xf32>
      %151 = arith.mulf %142, %124 : vector<8x128xf32>
      %152 = arith.mulf %136, %144 : vector<8x128xf32>
      %153 = arith.addf %151, %152 : vector<8x128xf32>
      %154 = math.tanh %153 : vector<8x128xf32>
      %155 = arith.mulf %150, %154 : vector<8x128xf32>
      %c0_88 = arith.constant 0 : index
      %c0_89 = arith.constant 0 : index
      %156 = vector.load %arg10[%c0_88, %c0_89] : memref<8x128xf32, #tpu.memory_space<vmem>>, vector<8x128xf32>
      tpu.vector_store %arg10[%c0_88, %c0_89], %155 {strides = array<i32>} : memref<8x128xf32, #tpu.memory_space<vmem>>, vector<8x128xf32>,
      %c0_90 = arith.constant 0 : index
      %c0_91 = arith.constant 0 : index
      %157 = vector.load %arg11[%c0_90, %c0_91] : memref<8x128xf32, #tpu.memory_space<vmem>>, vector<8x128xf32>
      tpu.vector_store %arg11[%c0_90, %c0_91], %153 {strides = array<i32>} : memref<8x128xf32, #tpu.memory_space<vmem>>, vector<8x128xf32>,
      %158 = vector.extract_strided_slice %155 {offsets = [0, 0], sizes = [8, 32], strides = [1, 1]} : vector<8x128xf32> to vector<8x32xf32>
      %159 = arith.truncf %158 : vector<8x32xf32> to vector<8x32xbf16>
      %c0_92 = arith.constant 0 : index
      %c0_93 = arith.constant 0 : index
      %160 = vector.load %arg13[%c0_92, %c0_93] : memref<8x32xbf16, #tpu.memory_space<vmem>>, vector<8x32xbf16>
      tpu.vector_store %arg13[%c0_92, %c0_93], %159 {strides = array<i32>} : memref<8x32xbf16, #tpu.memory_space<vmem>>, vector<8x32xbf16>,
    } else {
    }
    %c0 = arith.constant 0 : index
    %c0_1 = arith.constant 0 : index
    %3 = vector.load %arg13[%c0, %c0_1] : memref<8x32xbf16, #tpu.memory_space<vmem>>, vector<8x32xbf16>
    %c0_2 = arith.constant 0 : index
    %c0_3 = arith.constant 0 : index
    %4 = vector.load %arg5[%c0_2, %c0_3] : memref<32x512xbf16, #tpu.memory_space<vmem>>, vector<32x512xbf16>
    %cst = arith.constant dense<0.000000e+00> : vector<8x512xf32>
    %5 = tpu.matmul %3, %4, %cst {dimension_numbers = #tpu.dot_dimension_numbers<[1], [0], [0], [1], [0, 0, 1, 1], [], []>} : vector<8x32xbf16>, vector<32x512xbf16>, vector<8x512xf32> -> vector<8x512xf32>
    %c0_4 = arith.constant 0 : index
    %c0_5 = arith.constant 0 : index
    %6 = vector.load %arg6[%c0_4, %c0_5] : memref<1x512xf32, #tpu.memory_space<vmem>>, vector<1x512xf32>
    %7 = vector.broadcast %6 : vector<1x512xf32> to vector<8x512xf32>
    %8 = arith.addf %5, %7 : vector<8x512xf32>
    %c0_6 = arith.constant 0 : index
    %c0_7 = arith.constant 0 : index
    %9 = vector.load %arg9[%c0_6, %c0_7] : memref<8x512xf32, #tpu.memory_space<vmem>>, vector<8x512xf32>
    tpu.vector_store %arg9[%c0_6, %c0_7], %8 {strides = array<i32>} : memref<8x512xf32, #tpu.memory_space<vmem>>, vector<8x512xf32>,
    return
  }
  func.func @transform_1(%arg0: i32, %arg1: memref<8xi32, #tpu.memory_space<smem>>) -> (i32, i32) {
    %c0_i32 = arith.constant 0 : i32
    %c0_i32_0 = arith.constant 0 : i32
    %c0_i32_1 = arith.constant 0 : i32
    return %c0_i32, %c0_i32_0 : i32, i32
  }
  func.func @transform_2(%arg0: i32, %arg1: memref<8xi32, #tpu.memory_space<smem>>) -> (i32, i32) {
    %c0_i32 = arith.constant 0 : i32
    %c0_i32_0 = arith.constant 0 : i32
    %c0_i32_1 = arith.constant 0 : i32
    return %c0_i32, %c0_i32_0 : i32, i32
  }
  func.func @transform_3(%arg0: i32, %arg1: memref<8xi32, #tpu.memory_space<smem>>) -> (i32, i32) {
    %c0_i32 = arith.constant 0 : i32
    %c0_i32_0 = arith.constant 0 : i32
    return %c0_i32, %arg0 : i32, i32
  }
  func.func @transform_4(%arg0: i32, %arg1: memref<8xi32, #tpu.memory_space<smem>>) -> (i32, i32) {
    %c0_i32 = arith.constant 0 : i32
    %c0_i32_0 = arith.constant 0 : i32
    return %c0_i32, %arg0 : i32, i32
  }
  func.func @transform_5(%arg0: i32, %arg1: memref<8xi32, #tpu.memory_space<smem>>) -> (i32, i32) {
    %c0_i32 = arith.constant 0 : i32
    %c0_i32_0 = arith.constant 0 : i32
    %c0_i32_1 = arith.constant 0 : i32
    return %c0_i32, %c0_i32_0 : i32, i32
  }
  func.func @transform_6(%arg0: i32, %arg1: memref<8xi32, #tpu.memory_space<smem>>) -> (i32, i32) {
    %c0_i32 = arith.constant 0 : i32
    %c0_i32_0 = arith.constant 0 : i32
    %c0_i32_1 = arith.constant 0 : i32
    return %c0_i32, %c0_i32_0 : i32, i32
  }
  func.func @transform_7(%arg0: i32, %arg1: memref<8xi32, #tpu.memory_space<smem>>) -> (i32, i32) {
    %c0_i32 = arith.constant 0 : i32
    %c0_i32_0 = arith.constant 0 : i32
    return %c0_i32, %arg0 : i32, i32
  }
  func.func @transform_8(%arg0: i32, %arg1: memref<8xi32, #tpu.memory_space<smem>>) -> (i32, i32) {
    %c0_i32 = arith.constant 0 : i32
    %c0_i32_0 = arith.constant 0 : i32
    %c0_i32_1 = arith.constant 0 : i32
    return %c0_i32, %c0_i32_0 : i32, i32
  }
  func.func @transform_9(%arg0: i32, %arg1: memref<8xi32, #tpu.memory_space<smem>>) -> (i32, i32) {
    %c0_i32 = arith.constant 0 : i32
    %c0_i32_0 = arith.constant 0 : i32
    %c0_i32_1 = arith.constant 0 : i32
    return %c0_i32, %c0_i32_0 : i32, i32
  }
}

</mosaic_0001>

<bundles_post_ra>
// kernel: tpu_custom_call.1
= control target key start
LH: loop header
LB: loop body
LE: loop exit
PB: predicated region body
PF: predicated region fallthrough
CT: control target
= control target key end

     0   :  { %s1996_s16 = smov [#allocation6]   ;;  %s2453_s0 = inlined_call_operand.hbm [shape: s32[8], index: 0, kind: input, shape index: {}]   ;;  %s2454_s1 = inlined_call_operand.hbm [shape: f32[1200,512], index: 1, kind: input, shape index: {}]   ;;  %s2455_s2 = inlined_call_operand.hbm [shape: f32[128,512], index: 2, kind: input, shape index: {}]   ;;  %s2456_s3 = inlined_call_operand.hbm [shape: f32[1,512], index: 3, kind: input, shape index: {}]   ;;  %s2457_s4 = inlined_call_operand.hbm [shape: bf16[32,1536], index: 4, kind: input, shape index: {}]   ;;  %s2458_s5 = inlined_call_operand.hbm [shape: f32[1,1536], index: 5, kind: input, shape index: {}]   ;;  %s2459_s6 = inlined_call_operand.hbm [shape: f32[8,128], index: 6, kind: input, shape index: {}]   ;;  %s2460_s7 = inlined_call_operand.hbm [shape: f32[8,128], index: 7, kind: input, shape index: {}]   ;;  %s2461_s8 = inlined_call_operand.hbm [shape: f32[8,1536], index: 8, kind: output, shape index: {0}]   ;;  %s2462_s9 = inlined_call_operand.hbm [shape: f32[8,128], index: 9, kind: output, shape index: {1}]   ;;  %s2463_s10 = inlined_call_operand.hbm [shape: f32[8,128], index: 10, kind: output, shape index: {2}]  }
   0x1   :  { %2482 = sst [smem:[#allocation55_spill]] %s2455_s2  ;;  %s17_s15 = sshll.u32 %s2453_s0, 4  ;;  %s18_s15 = int_to_ptr.hbm [resolvable:$true] %s17_s15 }
   0x2   :  { %2483 = sst [smem:[#allocation56_spill]] %s2456_s3 }
   0x3   :  { %2484 = sst [smem:[#allocation57_spill]] %s2457_s4 }
   0x4   :  { %2485 = sst [smem:[#allocation58_spill]] %s2458_s5 }
   0x5   :  { %2486 = sst [smem:[#allocation59_spill]] %s2459_s6 }
   0x6   :  { %2487 = sst [smem:[#allocation60_spill]] %s2460_s7 }
   0x7   :  { %2488 = sst [smem:[#allocation61_spill]] %s2461_s8 }
   0x8   :  { %20 = dma.hbm_to_smem %s18_s15, 16, %s1996_s16, [#allocation5] }
   0x9   :  { %1934 = dma.done.wait [#allocation5], 16 }
   0xa   :  { %1935 = vsyncadd [#allocation5], 4294967280 }
   0xb   :  { %23 = sfence }
   0xc   :  { %24 = vsyncpa [#allocation8], 0 }
   0xd   :  { %25 = vsyncpa [#allocation11], 0 }
   0xe   :  { %26 = vsyncpa [#allocation16], 0 }
   0xf   :  { %27 = vsyncpa [#allocation9], 0 }
  0x10   :  { %29 = vsyncpa [#allocation9 + $0x1], 0 }
  0x11   :  { %30 = vsyncpa [#allocation19], 0  ;;  %s2076_s17 = smov 0   ;;  %s2078_s18 = smov 0  }
  0x12   :  { %s2080_s19 = smov 0   ;;  %s2082_s20 = smov 0  }
  0x13 LB: > { %2489 = sst [smem:[#allocation45_spill]] %s1982_s17  ;;  %s2097_s0 = sadd.s32 4294967295, %s1994_s20   ;;  %s1994_s20 = sphi %s2082_s20, %s2542_s20   ;;  %s1990_s19 = sphi %s2080_s19, %s2545_s19   ;;  %s1986_s18 = sphi %s2078_s18, %s2544_s18   ;;  %s1982_s17 = sphi %s2076_s17, %s2543_s17  }
  0x14   : > { %2490 = sst [smem:[#allocation46_spill]] %s1986_s18  ;;  %s1210_s21 = sadd.s32 4294967294, %s1994_s20  }
  0x15   : > { %2491 = sst [smem:[#allocation47_spill]] %s1990_s19  ;;  %s2101_s22 = sadd.s32 1, %s1994_s20  }
  0x16   : > { %2492 = sst [smem:[#allocation48_spill]] %s2101_s22  ;;  %s85_s23 = sadd.s32 1, %s1990_s19 }
  0x17   : > { %s82_s24 = ssub.s32 %s1994_s20, %s2101_s22  ;;  %p92_p0 = scmp.ne.s32.totalorder %s1990_s19, %s1986_s18 }
  0x18   : > { %p83_p1 = scmp.eq.s32.totalorder %s82_s24, 0  ;;  %p93_p2 = scmp.eq.s32.totalorder %s1994_s20, 0 }
  0x19   : > { %p98_p3 = scmp.ne.s32.totalorder %s1986_s18, %s1982_s17  ;;  %p2472_p4 = scmp.eq.s32.totalorder %s2097_s0, 0 }
  0x1a   : > { %s2113_s25 = scalar_select %p83_p1, %s1990_s19, %s85_s23  }
  0x1b   : > { %p2115_p5 = por %p93_p2, %p92_p0  ;;  %p2121_p6 = por %p2472_p4, %p98_p3 }
  0x1c   : > { %2493 = sst [smem:[#allocation49_spill]] %s2113_s25  ;;  %p2471_p7 = scmp.eq.s32.totalorder %s2097_s0, 2 }
  0x1d   : > { %p196_p8 = scmp.eq.s32.totalorder %s1210_s21, 2  ;;  %p1211_p9 = scmp.ge.s32.totalorder %s1994_s20, 1 }
  0x1e   : > { %p245_p10 = scmp.lt.s32.totalorder %s1994_s20, 4  ;;  %p2130_p11 = por %p2471_p7, %p92_p0 }
  0x1f   : > { %p2134_p12 = por %p196_p8, %p98_p3  ;;  %s2501_s2 = sld [smem:[#allocation55_spill]] }
  0x20   : > { %s2496_s28 = scalar_select %p2130_p11, 1, 0 }
  0x21   : > { %s2498_s29 = scalar_select %p2134_p12, 1, 0 }
  0x22   : > { %2497 = sst [smem:[#allocation50_spill]] %s2496_s28  ;;  %p2138_p13 = pnand %p1211_p9, %p245_p10 }
  0x23   : > { %2499 = sst [smem:[#allocation51_spill]] %s2498_s29  ;;  %s1997_s14 = smov [#allocation7]  }
  0x24   : > { %p1342_p2 = pneg %p2138_p13  ;;  %s258_s15 = sshll.u32 %s1997_s14, 4  ;;  %s259_s15 = int_to_ptr.vmem [resolvable:$true] %s258_s15 }
  0x25   : > { %s256_s13 = sshll.u32 %s2501_s2, 4  ;;  %p1370_p3 = scmp.lt.s32.totalorder %s1994_s20, 3  ;;  %s257_s13 = int_to_ptr.hbm [resolvable:$true] %s256_s13 }
  0x26   : > { %p2150_p0 = pnand %p1342_p2, %p2472_p4  ;;  %s1998_s21 = smov 512  }
  0x27   : > { %s1999_s23 = smov 32   ;;  %p2159_p8 = pnand %p1370_p3, %p2115_p5 }
  0x28   : > { %1345 = dma.hbm_to_vmem [thread:$0]  (!%p2150_p0), %s257_s13, 8192, %s259_s15, [#allocation8], %s1998_s21, %s1998_s21, %s1999_s23  }
  0x29   : > { %s2504_s3 = sld [smem:[#allocation56_spill]]  ;;  %s2000_s2 = smov [#allocation10]  }
  0x2a   : > { %s273_s25 = sshll.u32 %s2000_s2, 4  ;;  %s308_s22 = sand.u32 1, %s1994_s20   ;;  %s274_s25 = int_to_ptr.vmem [resolvable:$true] %s273_s25 }
  0x2b   : > { %s310_s29 = sand.u32 1, %s1990_s19   ;;  %s1302_s13 = sshll.u32 %s1994_s20, 4 }
  0x2c   : > { %s1217_s26 = sshll.u32 %s310_s29, 6  ;;  %s2505_s4 = sld [smem:[#allocation57_spill]] }
  0x2d   : > { %s312_s11 = scalar_lea.vmem [#allocation12], %s1217_s26  ;;  %s2506_s6 = sld [smem:[#allocation59_spill]] }
  0x2e   : > { %s320_s12 = sshll.u32 %s312_s11, 4  ;;  %p1526_p9 = pneg %p2159_p8  ;;  %s321_s12 = int_to_ptr.vmem [resolvable:$true] %s320_s12 }
  0x2f   : > { %s271_s14 = sshll.u32 %s2504_s3, 4  ;;  %s272_s14 = int_to_ptr.hbm [resolvable:$true] %s271_s14 }
  0x30   : > { %1348 = dma.hbm_to_vmem [thread:$0]  (!%p2150_p0), %s272_s14, 64, %s274_s25, [#allocation11]  }
  0x31   : > { %s2179_s25 = scalar_lea.sflag [#allocation8], %s308_s22 }
  0x32   : > { %s317_s23 = scalar_lea.hbm %s2505_s4, %s1302_s13  ;;  %s1529_s15 = scalar_lea.hbm %s2505_s4, 192 }
  0x33   : > { %s318_s17 = sshll.u32 %s317_s23, 4  ;;  %s283_s28 = sshll.u32 %s2506_s6, 4  ;;  %s319_s17 = int_to_ptr.hbm [resolvable:$true] %s318_s17  ;;  %s284_s28 = int_to_ptr.hbm [resolvable:$true] %s283_s28 }
  0x34   : > { %s1522_s14 = sshra.s32 %s319_s17, 4  ;;  %s1523_s14 = int_to_ptr.hbm [resolvable:$true] %s1522_s14 }
  0x35   : > { %s1524_s8 = scalar_lea.hbm %s1523_s14, 64  ;;  %p1530_p3 = scmp.lt.s32.totalorder %s1523_s14, %s2505_s4 }
  0x36   : > { %p1525_p5 = scmp.ne.s32.totalorder %s1523_s14, %s1524_s8  ;;  %p1531_p7 = scmp.lt.s32.totalorder %s1529_s15, %s1524_s8 }
  0x38   : > { %p1527_p10 = pnand %p1526_p9, %p1525_p5  ;;  %p1532_p1 = por %p1531_p7, %p1530_p3 }
  0x3a   : > { %p1528_p2 = pneg %p1527_p10 }
  0x3c   : > { %p1533_p4 = pnand %p1532_p1, %p1528_p2 }
  0x3e   : > { %1536 = shalt.err (!%p1533_p4)
}
  0x3f   : > { %s2001_s3 = smov 768   ;;  %s2002_s22 = smov 256  }
  0x40   : > { %s2003_s11 = smov 16   ;;  %s2004_s2 = smov [#allocation14]  }
  0x41   : > { %1358 = dma.hbm_to_vmem [thread:$0]  (!%p2159_p8), %s319_s17, 1024, %s321_s12, %s2179_s25, %s2001_s3, %s2002_s22, %s2003_s11  }
  0x42   : > { %s285_s26 = sshll.u32 %s2004_s2, 4  ;;  %s2507_s7 = sld [smem:[#allocation60_spill]]  ;;  %s286_s26 = int_to_ptr.vmem [resolvable:$true] %s285_s26 }
  0x43   : > { %1351 = dma.hbm_to_vmem [thread:$0]  (!%p2150_p0), %s284_s28, 128, %s286_s26, [#allocation11]  }
  0x44   : > { %s1220_s15 = sshll.u32 %s310_s29, 2  ;;  %s2005_s21 = smov [#allocation15]  }
  0x45   : > { %s297_s23 = sshll.u32 %s2005_s21, 4  ;;  %s1221_s4 = sshll.u32 %s1994_s20, 2  ;;  %s298_s23 = int_to_ptr.vmem [resolvable:$true] %s297_s23 }
  0x46   : > { %s2508_s5 = sld [smem:[#allocation58_spill]]  ;;  %s334_s22 = scalar_lea.vmem [#allocation13], %s1220_s15 }
  0x47   : > { %s342_s11 = sshll.u32 %s334_s22, 4  ;;  %s343_s11 = int_to_ptr.vmem [resolvable:$true] %s342_s11 }
  0x48   : > { %s295_s8 = sshll.u32 %s2507_s7, 4  ;;  %s296_s8 = int_to_ptr.hbm [resolvable:$true] %s295_s8 }
  0x49   : > { %1354 = dma.hbm_to_vmem [thread:$0]  (!%p2150_p0), %s296_s8, 128, %s298_s23, [#allocation16]  }
  0x4c   : > { %s338_s3 = scalar_lea.hbm %s2508_s5, %s1221_s4  ;;  %s1619_s26 = scalar_lea.hbm %s2508_s5, 12 }
  0x4d   : > { %s340_s2 = sshll.u32 %s338_s3, 4  ;;  %s341_s2 = int_to_ptr.hbm [resolvable:$true] %s340_s2 }
  0x4e   : > { %s1612_s13 = sshra.s32 %s341_s2, 4  ;;  %s1613_s13 = int_to_ptr.hbm [resolvable:$true] %s1612_s13 }
  0x4f   : > { %s1614_s28 = scalar_lea.hbm %s1613_s13, 4  ;;  %p1620_p0 = scmp.lt.s32.totalorder %s1613_s13, %s2508_s5 }
  0x50   : > { %p1615_p4 = scmp.ne.s32.totalorder %s1613_s13, %s1614_s28  ;;  %p1621_p5 = scmp.lt.s32.totalorder %s1619_s26, %s1614_s28 }
  0x52   : > { %p1617_p7 = pnand %p1615_p4, %p1526_p9  ;;  %p1622_p10 = por %p1621_p5, %p1620_p0 }
  0x54   : > { %p1618_p1 = pneg %p1617_p7 }
  0x56   : > { %p1623_p2 = pnand %p1622_p10, %p1618_p1 }
  0x58   : > { %1626 = shalt.err (!%p1623_p2)
}
  0x59   : > { %1361 = dma.hbm_to_vmem [thread:$0]  (!%p2159_p8), %s341_s2, 64, %s343_s11, %s2179_s25  }
  0x5a   : > { %351 = sbr.rel (%p2138_p13) target bundleno = 624 (0x270), region = 44  ;;  %p2509_p9 = scmp.eq.s32.totalorder (!%p2138_p13), %s2097_s0, 0 }
  0x5f   : > { %1937 = dma.done.wait (%p2509_p9), [#allocation8], 8192   ;;  %p2510_p3 = pmov %p2509_p9 }
  0x61   : > { %1939 = vsyncadd (%p2510_p3), [#allocation8], 4294959104  ;;  %p2511_p4 = pmov %p2510_p3 }
  0x62   : > { %p2512_p7 = pmov %p2510_p3 }
  0x63   : > { %1941 = dma.done.wait (%p2511_p4), [#allocation11], 64  }
  0x64   : > { %1943 = vsyncadd (%p2512_p7), [#allocation11], 4294967232  ;;  %s363_s4 = sand.u32 1, %s2097_s0   ;;  %s2232_s24 = sand.u32 1, %s1986_s18  }
  0x65   : > { %s1225_s30 = sshll.u32 %s2232_s24, 6  ;;  %s364_s25 = scalar_lea.sflag [#allocation8], %s363_s4 }
  0x66   : > { %s2235_s15 = scalar_lea.vmem [#allocation12], %s1225_s30 }
  0x67   : > { %1945 = dma.done.wait (%p2121_p6), %s364_s25, 1088  }
  0x68   : > { %1947 = vsyncadd (%p2121_p6), %s364_s25, 4294966208  ;;  %s1226_s21 = sshll.u32 %s2232_s24, 2  ;;  %p2513_p13 = pmov %p2510_p3 }
  0x69   : > { %s2242_s23 = scalar_lea.vmem [#allocation13], %s1226_s21 }
  0x6a   : > { %1949 = dma.done.wait (%p2513_p13), [#allocation11], 128   ;;  %p2514_p8 = pmov %p2510_p3 }
  0x6b   : > { %p2515_p1 = pmov %p2510_p3 }
  0x6c   : > { %1951 = vsyncadd (%p2514_p8), [#allocation11], 4294967168 }
  0x6d   : > { %1953 = dma.done.wait (%p2515_p1), [#allocation16], 128   ;;  %p2516_p0 = pmov %p2515_p1 }
  0x6e   : > { %s1229_s17 = sshll.u32 %s2232_s24, 5  ;;  %p2517_p6 = scmp.ne.s32.totalorder %s2097_s0, 0 }
  0x6f   : > { %1955 = vsyncadd (%p2516_p0), [#allocation16], 4294967168  ;;  %s2253_s27 = scalar_lea.vmem [#allocation17], %s1229_s17 }
  0x70   : > { %433 = sbr.rel (%p2517_p6) target bundleno = 469 (0x1d5), region = 72 }
  0x75   : > { %s434_s12 = sld [smem:[#allocation6]]  ;;  %s2006_s3 = smov [#allocation2]  }
  0x76   : > { %s2257_s22 = sshll.u32 %s2006_s3, 4  ;;  %s2260_s11 = sld [smem:[#allocation6 + $0x1]] }
  0x77   : > { %2518 = sst [smem:[#allocation52_spill]] %s2257_s22  ;;  %s2007_s2 = smov [#allocation2 + $0x1]  }
  0x78   : > { %s2262_s13 = sshll.u32 %s2007_s2, 4  ;;  %s2264_s28 = sld [smem:[#allocation6 + $0x2]] }
  0x79   : > { %2519 = sst [smem:[#allocation53_spill]] %s2262_s13  ;;  %s2008_s14 = smov [#allocation2 + $0x2]  }
  0x7a   : > { %s2267_s8 = sshll.u32 %s2008_s14, 4  ;;  %s2278_s14 = scalar_lea.hbm %s2454_s1, 4800 }
  0x7b   : > { %s435_s29 = sshrl.u32 %s434_s12, 3  ;;  %s436_s16 = sand.u32 7, %s434_s12  }
  0x7c   : > { %s1231_s26 = sshll.u32 %s435_s29, 5  ;;  %2520 = sst [smem:[#allocation54_spill]] %s2267_s8 }
  0x7d   : > { %s438_s4 = sadd.s32 %s1231_s26, %s436_s16  ;;  %s449_s17 = sshrl.u32 %s2260_s11, 3 }
  0x7e   : > { %s439_s21 = scalar_lea.hbm %s2454_s1, %s438_s4  ;;  %s450_s2 = sand.u32 7, %s2260_s11  }
  0x7f   : > { %s440_s3 = sshll.u32 %s439_s21, 4  ;;  %s1233_s22 = sshll.u32 %s449_s17, 5  ;;  %s441_s3 = int_to_ptr.hbm [resolvable:$true] %s440_s3 }
  0x80   : > { %s1642_s5 = sshra.s32 %s441_s3, 4  ;;  %s1643_s5 = int_to_ptr.hbm [resolvable:$true] %s1642_s5 }
  0x81   : > { %s1644_s13 = scalar_lea.hbm %s1643_s5, 4  ;;  %p1647_p10 = scmp.lt.s32.totalorder %s1643_s5, %s2454_s1 }
  0x82   : > { %p1645_p5 = scmp.ne.s32.totalorder %s1643_s5, %s1644_s13  ;;  %p1648_p2 = scmp.lt.s32.totalorder %s2278_s14, %s1644_s13 }
  0x84   : > { %p1649_p9 = por %p1648_p2, %p1647_p10 }
  0x86   : > { %p1650_p3 = pnand %p1649_p9, %p1645_p5 }
  0x88   : > { %1653 = shalt.err (!%p1650_p3)  }
  0x89   : > { %s2480_s11 = smov 128   ;;  %s2521_s4 = sld [smem:[#allocation52_spill]] }
  0x8a   : > { %s2010_s30 = smov 1   ;;  %s452_s21 = sadd.s32 %s1233_s22, %s450_s2 }
  0x8b   : > { %s465_s17 = sshrl.u32 %s2264_s28, 3  ;;  %s453_s5 = scalar_lea.hbm %s2454_s1, %s452_s21 }
  0x8c   : > { %s466_s13 = sand.u32 7, %s2264_s28   ;;  %s456_s16 = sshll.u32 %s453_s5, 4  ;;  %s457_s16 = int_to_ptr.hbm [resolvable:$true] %s456_s16 }
  0x8d   : > { %s1235_s26 = sshll.u32 %s465_s17, 5  ;;  %s1666_s6 = sshra.s32 %s457_s16, 4  ;;  %s1667_s6 = int_to_ptr.hbm [resolvable:$true] %s1666_s6 }
  0x8e   : > { %s468_s8 = sadd.s32 %s1235_s26, %s466_s13  ;;  %s1668_s7 = scalar_lea.hbm %s1667_s6, 4 }
  0x8f   : > { %s2522_s25 = int_to_ptr.vmem [resolvable:$true] %s2521_s4  ;;  %p1669_p4 = scmp.ne.s32.totalorder %s1667_s6, %s1668_s7 }
  0x90   : > { %447 = dma.hbm_to_vmem [thread:$0]  %s441_s3, 64, %s2522_s25, [#allocation4], %s2480_s11, %s2480_s11, %s2010_s30 }
  0x91   : > { %p1671_p7 = scmp.lt.s32.totalorder %s1667_s6, %s2454_s1  ;;  %p1672_p13 = scmp.lt.s32.totalorder %s2278_s14, %s1668_s7 }
  0x93   : > { %p1673_p8 = por %p1672_p13, %p1671_p7 }
  0x95   : > { %p1674_p1 = pnand %p1673_p8, %p1669_p4 }
  0x97   : > { %1677 = shalt.err (!%p1674_p1)  }
  0x98   : > { %s2523_s22 = sld [smem:[#allocation53_spill]]  ;;  %s469_s4 = scalar_lea.hbm %s2454_s1, %s468_s8 }
  0x99   : > { %s1236_s25 = sld [smem:[#allocation6 + $0x3]]  ;;  %s472_s21 = sshll.u32 %s469_s4, 4  ;;  %s473_s21 = int_to_ptr.hbm [resolvable:$true] %s472_s21 }
  0x9a   : > { %s2011_s18 = smov [#allocation2 + $0x3]   ;;  %s1690_s7 = sshra.s32 %s473_s21, 4  ;;  %s1691_s7 = int_to_ptr.hbm [resolvable:$true] %s1690_s7 }
  0x9b   : > { %s2306_s6 = sshll.u32 %s2011_s18, 4  ;;  %s1692_s19 = scalar_lea.hbm %s1691_s7, 4  ;;  %s491_s6 = int_to_ptr.vmem [resolvable:$true] %s2306_s6 }
  0x9c   : > { %p1693_p0 = scmp.ne.s32.totalorder %s1691_s7, %s1692_s19  ;;  %p1695_p6 = scmp.lt.s32.totalorder %s1691_s7, %s2454_s1 }
  0x9d   : > { %p1696_p5 = scmp.lt.s32.totalorder %s2278_s14, %s1692_s19 }
  0x9e   : > { %s2524_s28 = int_to_ptr.vmem [resolvable:$true] %s2523_s22 }
  0x9f   : > { %463 = dma.hbm_to_vmem [thread:$0]  %s457_s16, 64, %s2524_s28, [#allocation4 + $0x1], %s2480_s11, %s2480_s11, %s2010_s30 }
  0xa0   : > { %p1697_p10 = por %p1696_p5, %p1695_p6 }
  0xa2   : > { %p1698_p2 = pnand %p1697_p10, %p1693_p0 }
  0xa4   : > { %1701 = shalt.err (!%p1698_p2)  }
  0xa5   : > { %s2525_s8 = sld [smem:[#allocation54_spill]]  ;;  %s481_s16 = sshrl.u32 %s1236_s25, 3 }
  0xa6   : > { %s1238_s5 = sld [smem:[#allocation6 + $0x4]]  ;;  %s482_s26 = sand.u32 7, %s1236_s25  }
  0xa7   : > { %s2318_s13 = sld [smem:[#allocation6 + $0x5]]  ;;  %s1237_s22 = sshll.u32 %s481_s16, 5 }
  0xa8   : > { %s2012_s28 = smov [#allocation2 + $0x4]   ;;  %s484_s2 = sadd.s32 %s1237_s22, %s482_s26 }
  0xa9   : > { %s2320_s3 = sshll.u32 %s2012_s28, 4  ;;  %s485_s7 = scalar_lea.hbm %s2454_s1, %s484_s2 }
  0xaa   : > { %2527 = sst [smem:[#allocation52_spill]] %s2320_s3  ;;  %s488_s19 = sshll.u32 %s485_s7, 4  ;;  %s489_s19 = int_to_ptr.hbm [resolvable:$true] %s488_s19 }
  0xab   : > { %s2526_s29 = int_to_ptr.vmem [resolvable:$true] %s2525_s8  ;;  %s1714_s12 = sshra.s32 %s489_s19, 4  ;;  %s1715_s12 = int_to_ptr.hbm [resolvable:$true] %s1714_s12 }
  0xac   : > { %479 = dma.hbm_to_vmem [thread:$0]  %s473_s21, 64, %s2526_s29, [#allocation4 + $0x2], %s2480_s11, %s2480_s11, %s2010_s30 }
  0xad   : > { %s497_s21 = sshrl.u32 %s1238_s5, 3  ;;  %s498_s17 = sand.u32 7, %s1238_s5  }
  0xae   : > { %s1716_s8 = scalar_lea.hbm %s1715_s12, 4  ;;  %p1719_p3 = scmp.lt.s32.totalorder %s1715_s12, %s2454_s1 }
  0xaf   : > { %p1717_p9 = scmp.ne.s32.totalorder %s1715_s12, %s1716_s8  ;;  %p1720_p4 = scmp.lt.s32.totalorder %s2278_s14, %s1716_s8 }
  0xb1   : > { %p1721_p7 = por %p1720_p4, %p1719_p3 }
  0xb3   : > { %p1722_p13 = pnand %p1721_p7, %p1717_p9 }
  0xb5   : > { %1725 = shalt.err (!%p1722_p13)  }
  0xb6   : > { %495 = dma.hbm_to_vmem [thread:$0]  %s489_s19, 64, %s491_s6, [#allocation4 + $0x3], %s2480_s11, %s2480_s11, %s2010_s30 }
  0xb7   : > { %s1239_s5 = sshll.u32 %s497_s21, 5  ;;  %s513_s16 = sshrl.u32 %s2318_s13, 3 }
  0xb8   : > { %s500_s26 = sadd.s32 %s1239_s5, %s498_s17  ;;  %s514_s22 = sand.u32 7, %s2318_s13  }
  0xb9   : > { %s501_s4 = scalar_lea.hbm %s2454_s1, %s500_s26  ;;  %s1241_s18 = sshll.u32 %s513_s16, 5 }
  0xba   : > { %s504_s7 = sshll.u32 %s501_s4, 4  ;;  %s516_s12 = sadd.s32 %s1241_s18, %s514_s22  ;;  %s505_s7 = int_to_ptr.hbm [resolvable:$true] %s504_s7 }
  0xbb   : > { %s517_s29 = scalar_lea.hbm %s2454_s1, %s516_s12  ;;  %s1738_s3 = sshra.s32 %s505_s7, 4  ;;  %s1739_s3 = int_to_ptr.hbm [resolvable:$true] %s1738_s3 }
  0xbc   : > { %s1740_s6 = scalar_lea.hbm %s1739_s3, 4  ;;  %p1743_p1 = scmp.lt.s32.totalorder %s1739_s3, %s2454_s1 }
  0xbd   : > { %p1741_p8 = scmp.ne.s32.totalorder %s1739_s3, %s1740_s6  ;;  %p1744_p0 = scmp.lt.s32.totalorder %s2278_s14, %s1740_s6 }
  0xbf   : > { %p1745_p6 = por %p1744_p0, %p1743_p1 }
  0xc1   : > { %p1746_p5 = pnand %p1745_p6, %p1741_p8 }
  0xc3   : > { %1749 = shalt.err (!%p1746_p5)  }
  0xc4   : > { %s2528_s13 = sld [smem:[#allocation52_spill]]  ;;  %s520_s5 = sshll.u32 %s517_s29, 4  ;;  %s521_s5 = int_to_ptr.hbm [resolvable:$true] %s520_s5 }
  0xc5   : > { %s2013_s16 = smov [#allocation2 + $0x5]   ;;  %s1762_s22 = sshra.s32 %s521_s5, 4  ;;  %s1763_s22 = int_to_ptr.hbm [resolvable:$true] %s1762_s22 }
  0xc6   : > { %s522_s26 = sshll.u32 %s2013_s16, 4  ;;  %s1764_s28 = scalar_lea.hbm %s1763_s22, 4  ;;  %s523_s26 = int_to_ptr.vmem [resolvable:$true] %s522_s26 }
  0xc7   : > { %p1765_p10 = scmp.ne.s32.totalorder %s1763_s22, %s1764_s28  ;;  %p1767_p2 = scmp.lt.s32.totalorder %s1763_s22, %s2454_s1 }
  0xc8   : > { %p1768_p9 = scmp.lt.s32.totalorder %s2278_s14, %s1764_s28 }
  0xca   : > { %s2529_s17 = int_to_ptr.vmem [resolvable:$true] %s2528_s13  ;;  %p1769_p3 = por %p1768_p9, %p1767_p2 }
  0xcb   : > { %511 = dma.hbm_to_vmem [thread:$0]  %s505_s7, 64, %s2529_s17, [#allocation4 + $0x4], %s2480_s11, %s2480_s11, %s2010_s30 }
  0xcc   : > { %p1770_p4 = pnand %p1769_p3, %p1765_p10 }
  0xce   : > { %1773 = shalt.err (!%p1770_p4)  }
  0xcf   : > { %527 = dma.hbm_to_vmem [thread:$0]  %s521_s5, 64, %s523_s26, [#allocation4 + $0x5], %s2480_s11, %s2480_s11, %s2010_s30 }
  0xd0   : > { %s1242_s4 = sld [smem:[#allocation6 + $0x6]]  ;;  %s2014_s7 = smov [#allocation2 + $0x6]  }
  0xd1   : > { %s1244_s18 = sld [smem:[#allocation6 + $0x7]]  ;;  %s2357_s12 = sshll.u32 %s2014_s7, 4  ;;  %s539_s12 = int_to_ptr.vmem [resolvable:$true] %s2357_s12 }
  0xd2   : > { %s2015_s8 = smov [#allocation2 + $0x7]  }
  0xd3   : > { %s2359_s25 = sshll.u32 %s2015_s8, 4 }
  0xd4   : > { %2530 = sst [smem:[#allocation53_spill]] %s2359_s25 }
  0xd6   : > { %s529_s29 = sshrl.u32 %s1242_s4, 3  ;;  %s530_s6 = sand.u32 7, %s1242_s4  }
  0xd7   : > { %s1243_s19 = sshll.u32 %s529_s29, 5  ;;  %s545_s21 = sshrl.u32 %s1244_s18, 3 }
  0xd8   : > { %s532_s13 = sadd.s32 %s1243_s19, %s530_s6  ;;  %s546_s17 = sand.u32 7, %s1244_s18  }
  0xd9   : > { %s533_s26 = scalar_lea.hbm %s2454_s1, %s532_s13  ;;  %s1245_s22 = sshll.u32 %s545_s21, 5 }
  0xda   : > { %s536_s28 = sshll.u32 %s533_s26, 4  ;;  %s548_s3 = sadd.s32 %s1245_s22, %s546_s17  ;;  %s537_s28 = int_to_ptr.hbm [resolvable:$true] %s536_s28 }
  0xdb   : > { %s549_s8 = scalar_lea.hbm %s2454_s1, %s548_s3  ;;  %s1786_s25 = sshra.s32 %s537_s28, 4  ;;  %s1787_s25 = int_to_ptr.hbm [resolvable:$true] %s1786_s25 }
  0xdc   : > { %s1788_s4 = scalar_lea.hbm %s1787_s25, 4  ;;  %p1791_p13 = scmp.lt.s32.totalorder %s1787_s25, %s2454_s1 }
  0xdd   : > { %p1789_p7 = scmp.ne.s32.totalorder %s1787_s25, %s1788_s4  ;;  %p1792_p8 = scmp.lt.s32.totalorder %s2278_s14, %s1788_s4 }
  0xdf   : > { %p1793_p1 = por %p1792_p8, %p1791_p13 }
  0xe1   : > { %p1794_p0 = pnand %p1793_p1, %p1789_p7 }
  0xe3   : > { %1797 = shalt.err (!%p1794_p0)  }
  0xe4   : > { %s2531_s18 = smov 128   ;;  %s552_s6 = sshll.u32 %s549_s8, 4  ;;  %s553_s6 = int_to_ptr.hbm [resolvable:$true] %s552_s6 }
  0xe5   : > { %543 = dma.hbm_to_vmem [thread:$0]  %s537_s28, 64, %s539_s12, [#allocation4 + $0x6], %s2531_s18, %s2531_s18, %s2010_s30 }
  0xe6   : > { %s1810_s19 = sshra.s32 %s553_s6, 4  ;;  %s1811_s19 = int_to_ptr.hbm [resolvable:$true] %s1810_s19 }
  0xe7   : > { %s1812_s21 = scalar_lea.hbm %s1811_s19, 4  ;;  %p1815_p5 = scmp.lt.s32.totalorder %s1811_s19, %s2454_s1 }
  0xe8   : > { %p1813_p6 = scmp.ne.s32.totalorder %s1811_s19, %s1812_s21  ;;  %p1816_p10 = scmp.lt.s32.totalorder %s2278_s14, %s1812_s21 }
  0xea   : > { %p1817_p2 = por %p1816_p10, %p1815_p5 }
  0xec   : > { %p1818_p9 = pnand %p1817_p2, %p1813_p6 }
  0xee   : > { %1821 = shalt.err (!%p1818_p9)  }
  0xef   : > { %s2532_s11 = sld [smem:[#allocation53_spill]] }
  0xf5   : > { %s2533_s25 = int_to_ptr.vmem [resolvable:$true] %s2532_s11 }
  0xf6   : > { %559 = dma.hbm_to_vmem [thread:$0]  %s553_s6, 64, %s2533_s25, [#allocation4 + $0x7], %s2531_s18, %s2531_s18, %s2010_s30 }
  0xf7   : > { %1956 = dma.done.wait [#allocation4], 64 }
  0xf8   : > { %1957 = vsyncadd [#allocation4], 4294967232 }
  0xf9   : > { %1958 = dma.done.wait [#allocation4 + $0x1], 64 }
  0xfa   : > { %1959 = vsyncadd [#allocation4 + $0x1], 4294967232 }
  0xfb   : > { %1960 = dma.done.wait [#allocation4 + $0x2], 64 }
  0xfc   : > { %1961 = vsyncadd [#allocation4 + $0x2], 4294967232 }
  0xfd   : > { %1962 = dma.done.wait [#allocation4 + $0x3], 64 }
  0xfe   : > { %1963 = vsyncadd [#allocation4 + $0x3], 4294967232 }
  0xff   : > { %1964 = dma.done.wait [#allocation4 + $0x4], 64 }
 0x100   : > { %1965 = vsyncadd [#allocation4 + $0x4], 4294967232 }
 0x101   : > { %1966 = dma.done.wait [#allocation4 + $0x5], 64 }
 0x102   : > { %1967 = vsyncadd [#allocation4 + $0x5], 4294967232 }
 0x103   : > { %1968 = dma.done.wait [#allocation4 + $0x6], 64 }
 0x104   : > { %1969 = vsyncadd [#allocation4 + $0x6], 4294967232 }
 0x105   : > { %1970 = dma.done.wait [#allocation4 + $0x7], 64 }
 0x106   : > { %1971 = vsyncadd [#allocation4 + $0x7], 4294967232  ;;  %v650_v0 = vld [vmem:[#allocation7 + $0x1e0] sm:$0xff]  ;;  %v651_v1 = vld [vmem:[#allocation7 + $0x1e8] sm:$0xff]  ;;  %vm818_vm12 = vcmask 257024  }
 0x107   : > { %v653_v2 = vld [vmem:[#allocation7 + $0x1f8] sm:$0xff]  ;;  %655 = vmatpush.msra.mxu0 %v650_v0  ;;  %675 = vmatpush.msra.mxu1 %v651_v1  ;;  %v646_v3 = vld [vmem:[#allocation7 + $0x1c0] sm:$0xff]  ;;  %v647_v4 = vld [vmem:[#allocation7 + $0x1c8] sm:$0xff] }
 0x108   : > { %v649_v5 = vld [vmem:[#allocation7 + $0x1d8] sm:$0xff]  ;;  %715 = vmatpush.msra.mxu3 %v653_v2  ;;  %v642_v6 = vld [vmem:[#allocation7 + $0x1a0] sm:$0xff]  ;;  %v643_v7 = vld [vmem:[#allocation7 + $0x1a8] sm:$0xff] }
 0x109   : > { %656 = vmatpush.msra.mxu0 %v646_v3  ;;  %676 = vmatpush.msra.mxu1 %v647_v4  ;;  %v645_v8 = vld [vmem:[#allocation7 + $0x1b8] sm:$0xff]  ;;  %v638_v9 = vld [vmem:[#allocation7 + $0x180] sm:$0xff]  ;;  %v639_v10 = vld [vmem:[#allocation7 + $0x188] sm:$0xff] }
 0x10a   : > { %716 = vmatpush.msra.mxu3 %v649_v5  ;;  %v641_v11 = vld [vmem:[#allocation7 + $0x198] sm:$0xff]  ;;  %v634_v12 = vld [vmem:[#allocation7 + $0x160] sm:$0xff]  ;;  %v635_v13 = vld [vmem:[#allocation7 + $0x168] sm:$0xff] }
 0x10b   : > { %657 = vmatpush.msra.mxu0 %v642_v6  ;;  %677 = vmatpush.msra.mxu1 %v643_v7  ;;  %v637_v14 = vld [vmem:[#allocation7 + $0x178] sm:$0xff]  ;;  %v630_v15 = vld [vmem:[#allocation7 + $0x140] sm:$0xff]  ;;  %v631_v16 = vld [vmem:[#allocation7 + $0x148] sm:$0xff] }
 0x10c   : > { %717 = vmatpush.msra.mxu3 %v645_v8  ;;  %v652_v17 = vld [vmem:[#allocation7 + $0x1f0] sm:$0xff]  ;;  %v633_v18 = vld [vmem:[#allocation7 + $0x158] sm:$0xff]  ;;  %v626_v20 = vld [vmem:[#allocation7 + $0x120] sm:$0xff] }
 0x10d   : > { %658 = vmatpush.msra.mxu0 %v638_v9  ;;  %678 = vmatpush.msra.mxu1 %v639_v10  ;;  %v648_v19 = vld [vmem:[#allocation7 + $0x1d0] sm:$0xff]  ;;  %v627_v21 = vld [vmem:[#allocation7 + $0x128] sm:$0xff]  ;;  %v629_v22 = vld [vmem:[#allocation7 + $0x138] sm:$0xff] }
 0x10e   : > { %718 = vmatpush.msra.mxu3 %v641_v11  ;;  %695 = vmatpush.msra.mxu2 %v652_v17  ;;  %v644_v23 = vld [vmem:[#allocation7 + $0x1b0] sm:$0xff]  ;;  %v622_v24 = vld [vmem:[#allocation7 + $0x100] sm:$0xff]  ;;  %v623_v25 = vld [vmem:[#allocation7 + $0x108] sm:$0xff] }
 0x10f   : > { %659 = vmatpush.msra.mxu0 %v634_v12  ;;  %679 = vmatpush.msra.mxu1 %v635_v13  ;;  %v625_v26 = vld [vmem:[#allocation7 + $0x118] sm:$0xff]  ;;  %v640_v27 = vld [vmem:[#allocation7 + $0x190] sm:$0xff]  ;;  %v618_v28 = vld [vmem:[#allocation7 + $0xe0] sm:$0xff] }
 0x110   : > { %719 = vmatpush.msra.mxu3 %v637_v14  ;;  %696 = vmatpush.msra.mxu2 %v648_v19  ;;  %v619_v29 = vld [vmem:[#allocation7 + $0xe8] sm:$0xff]  ;;  %v621_v30 = vld [vmem:[#allocation7 + $0xf8] sm:$0xff]  ;;  %v636_v31 = vld [vmem:[#allocation7 + $0x170] sm:$0xff] }
 0x111   : > { %660 = vmatpush.msra.mxu0 %v630_v15  ;;  %680 = vmatpush.msra.mxu1 %v631_v16  ;;  %v614_v32 = vld [vmem:[#allocation7 + $0xc0] sm:$0xff]  ;;  %v615_v33 = vld [vmem:[#allocation7 + $0xc8] sm:$0xff]  ;;  %v617_v34 = vld [vmem:[#allocation7 + $0xd8] sm:$0xff] }
 0x112   : > { %720 = vmatpush.msra.mxu3 %v633_v18  ;;  %697 = vmatpush.msra.mxu2 %v644_v23  ;;  %v632_v35 = vld [vmem:[#allocation7 + $0x150] sm:$0xff]  ;;  %v610_v36 = vld [vmem:[#allocation7 + $0xa0] sm:$0xff]  ;;  %v611_v37 = vld [vmem:[#allocation7 + $0xa8] sm:$0xff] }
 0x113   : > { %661 = vmatpush.msra.mxu0 %v626_v20  ;;  %681 = vmatpush.msra.mxu1 %v627_v21  ;;  %v613_v38 = vld [vmem:[#allocation7 + $0xb8] sm:$0xff]  ;;  %v628_v39 = vld [vmem:[#allocation7 + $0x130] sm:$0xff]  ;;  %v606_v40 = vld [vmem:[#allocation7 + $0x80] sm:$0xff] }
 0x114   : > { %721 = vmatpush.msra.mxu3 %v629_v22  ;;  %698 = vmatpush.msra.mxu2 %v640_v27  ;;  %v607_v41 = vld [vmem:[#allocation7 + $0x88] sm:$0xff]  ;;  %v609_v42 = vld [vmem:[#allocation7 + $0x98] sm:$0xff]  ;;  %v624_v43 = vld [vmem:[#allocation7 + $0x110] sm:$0xff] }
 0x115   : > { %662 = vmatpush.msra.mxu0 %v622_v24  ;;  %682 = vmatpush.msra.mxu1 %v623_v25  ;;  %v602_v44 = vld [vmem:[#allocation7 + $0x60] sm:$0xff]  ;;  %v603_v45 = vld [vmem:[#allocation7 + $0x68] sm:$0xff]  ;;  %v605_v46 = vld [vmem:[#allocation7 + $0x78] sm:$0xff] }
 0x116   : > { %722 = vmatpush.msra.mxu3 %v625_v26  ;;  %699 = vmatpush.msra.mxu2 %v636_v31  ;;  %v620_v47 = vld [vmem:[#allocation7 + $0xf0] sm:$0xff]  ;;  %v598_v48 = vld [vmem:[#allocation7 + $0x40] sm:$0xff]  ;;  %v599_v49 = vld [vmem:[#allocation7 + $0x48] sm:$0xff] }
 0x117   : > { %663 = vmatpush.msra.mxu0 %v618_v28  ;;  %683 = vmatpush.msra.mxu1 %v619_v29  ;;  %v601_v50 = vld [vmem:[#allocation7 + $0x58] sm:$0xff]  ;;  %v616_v51 = vld [vmem:[#allocation7 + $0xd0] sm:$0xff]  ;;  %v594_v52 = vld [vmem:[#allocation7 + $0x20] sm:$0xff] }
 0x118   : > { %723 = vmatpush.msra.mxu3 %v621_v30  ;;  %700 = vmatpush.msra.mxu2 %v632_v35  ;;  %v595_v53 = vld [vmem:[#allocation7 + $0x28] sm:$0xff]  ;;  %v597_v54 = vld [vmem:[#allocation7 + $0x38] sm:$0xff]  ;;  %v612_v55 = vld [vmem:[#allocation7 + $0xb0] sm:$0xff] }
 0x119   : > { %664 = vmatpush.msra.mxu0 %v614_v32  ;;  %684 = vmatpush.msra.mxu1 %v615_v33  ;;  %v590_v56 = vld [vmem:[#allocation7] sm:$0xff]  ;;  %v591_v57 = vld [vmem:[#allocation7 + $0x8] sm:$0xff]  ;;  %v593_v58 = vld [vmem:[#allocation7 + $0x18] sm:$0xff] }
 0x11a   : > { %724 = vmatpush.msra.mxu3 %v617_v34  ;;  %701 = vmatpush.msra.mxu2 %v628_v39  ;;  %v588_v59 = vld [vmem:[#allocation14] sm:$0xff]  ;;  %v654_v1 = vld [vmem:[#allocation10] sm:$0xf]  ;;  %v585_v4 = vld [vmem:[#allocation2 + $0x8] sm:$0xff] }
 0x11b   : > { %665 = vmatpush.msra.mxu0 %v610_v36  ;;  %685 = vmatpush.msra.mxu1 %v611_v37  ;;  %v608_v60 = vld [vmem:[#allocation7 + $0x90] sm:$0xff]  ;;  %v584_v2 = vld [vmem:[#allocation2] sm:$0xff]  ;;  %v740_v3 = vperm.slane %v654_v1, 0  ;;  %v741_v6 = vperm.slane %v654_v1, 1  ;;  %v743_v15 = vperm.slane %v654_v1, 3  ;;  %v742_v25 = vperm.slane %v654_v1, 2 }
 0x11c   : > { %725 = vmatpush.msra.mxu3 %v613_v38  ;;  %702 = vmatpush.msra.mxu2 %v624_v43  ;;  %v604_v61 = vld [vmem:[#allocation7 + $0x70] sm:$0xff] }
 0x11d   : > { %666 = vmatpush.msra.mxu0 %v606_v40  ;;  %686 = vmatpush.msra.mxu1 %v607_v41  ;;  %v600_v62 = vld [vmem:[#allocation7 + $0x50] sm:$0xff] }
 0x11e   : > { %726 = vmatpush.msra.mxu3 %v609_v42  ;;  %703 = vmatpush.msra.mxu2 %v620_v47  ;;  %v596_v63 = vld [vmem:[#allocation7 + $0x30] sm:$0xff] }
 0x11f   : > { %667 = vmatpush.msra.mxu0 %v602_v44  ;;  %687 = vmatpush.msra.mxu1 %v603_v45  ;;  %v592_v0 = vld [vmem:[#allocation7 + $0x10] sm:$0xff] }
 0x120   : > { %727 = vmatpush.msra.mxu3 %v605_v46  ;;  %704 = vmatpush.msra.mxu2 %v616_v51  ;;  %v587_v13 = vld [vmem:[#allocation2 + $0x18] sm:$0xff]  ;;  %v586_v24 = vld [vmem:[#allocation2 + $0x10] sm:$0xff] }
 0x121   : > { %668 = vmatpush.msra.mxu0 %v598_v48  ;;  %688 = vmatpush.msra.mxu1 %v599_v49 }
 0x122   : > { %728 = vmatpush.msra.mxu3 %v601_v50  ;;  %705 = vmatpush.msra.mxu2 %v612_v55  ;;  %v589_v50 = vld [vmem:[#allocation15] sm:$0xff] }
 0x123   : > { %669 = vmatpush.msra.mxu0 %v594_v52  ;;  %689 = vmatpush.msra.mxu1 %v595_v53 }
 0x124   : > { %729 = vmatpush.msra.mxu3 %v597_v54  ;;  %706 = vmatpush.msra.mxu2 %v608_v60 }
 0x125   : > { %670 = vmatpush.msra.mxu0 %v590_v56  ;;  %690 = vmatpush.msra.mxu1 %v591_v57 }
 0x126   : > { %730 = vmatpush.msra.mxu3 %v593_v58  ;;  %671 = vmatmul.f32.vlgmr.msra.gmra.mxu0 %v588_v59 }
 0x127   : > { %691 = vmatmul.f32.vlgmr.msra.gmra.mxu1 %v588_v59  ;;  %731 = vmatmul.f32.vlgmr.msra.gmra.mxu3 %v588_v59 }
 0x128   : > { %707 = vmatpush.msra.mxu2 %v604_v61 }
 0x12a   : > { %708 = vmatpush.msra.mxu2 %v600_v62 }
 0x12c   : > { %709 = vmatpush.msra.mxu2 %v596_v63 }
 0x12e   : > { %710 = vmatpush.msra.mxu2 %v592_v0 }
 0x12f   : > { %711 = vmatmul.f32.vlgmr.msra.gmra.mxu2 %v588_v59 }
 0x1a3   : > { %v672_v5 = vpop.f32.mrf.mxu0 }
 0x1a4   : > { %v735_v7 = vadd.f32 %v672_v5, %v584_v2  ;;  %v692_v8 = vpop.f32.mrf.mxu1 }
 0x1a5   : > { %v736_v9 = vadd.f32 %v692_v8, %v585_v4 }
 0x1a6   : > { %v748_v10 = vadd.f32 %v740_v3, %v735_v7 }
 0x1a7   : > { %v749_v11 = vadd.f32 %v741_v6, %v736_v9 }
 0x1a8   : > { %v1246_v12 = vmul.f32 -1.442695, %v748_v10 }
 0x1a9   : > { %v1247_v14 = vmul.f32 -1.442695, %v749_v11 }
 0x1aa   : > { %1434 = vpow2.f32 %v1246_v12  ;;  %v732_v16 = vpop.f32.mrf.mxu3 }
 0x1ab   : > { %1436 = vpow2.f32 %v1247_v14  ;;  %v738_v17 = vadd.f32 %v732_v16, %v587_v13 }
 0x1ad   : > { %v751_v18 = vadd.f32 %v743_v15, %v738_v17 }
 0x1af   : > { %v1248_v19 = vmul.f32 -1.442695, %v751_v18 }
 0x1b0   : > { %v1435_v20 = vpop.eup %1434 }
 0x1b1   : > { %v1437_v21 = vpop.eup %1436  ;;  %v755_v22 = vadd.f32 1.0, %v1435_v20  ;;  %1438 = vpow2.f32 %v1248_v19 }
 0x1b2   : > { %v774_v23 = vadd.f32 1.0, %v1437_v21  ;;  %v712_v26 = vpop.f32.mrf.mxu2 }
 0x1b3   : > { %1440 = vrcp.f32 %v755_v22  ;;  %v737_v27 = vadd.f32 %v712_v26, %v586_v24  ;;  %v767_v37 = vand.u32 2147483648, %v755_v22  ;;  %v765_v40 = vand.u32 2147483647, %v755_v22 }
 0x1b4   : > { %1442 = vrcp.f32 %v774_v23  ;;  %v786_v38 = vand.u32 2147483648, %v774_v23  ;;  %v784_v42 = vand.u32 2147483647, %v774_v23  ;;  %vm761_vm2 = vweird.f32 %v755_v22 }
 0x1b5   : > { %v750_v29 = vadd.f32 %v742_v25, %v737_v27  ;;  %vm780_vm3 = vweird.f32 %v774_v23  ;;  %v768_v47 = vor.u32 1.1754944e-38, %v767_v37  ;;  %vm766_vm6 = vcmp.eq.f32.partialorder %v765_v40, 8.507059e+37 }
 0x1b6   : > { %v787_v49 = vor.u32 1.1754944e-38, %v786_v38  ;;  %vm785_vm7 = vcmp.eq.f32.partialorder %v784_v42, 8.507059e+37 }
 0x1b7   : > { %v1439_v28 = vpop.eup %1438 }
 0x1b8   : > { %v794_v30 = vadd.f32 1.0, %v1439_v28 }
 0x1b9   : > { %v1441_v31 = vpop.eup %1440 }
 0x1ba   : > { %v1443_v32 = vpop.eup %1442  ;;  %v757_v33 = vmul.f32 %v1441_v31, %v755_v22  ;;  %1444 = vrcp.f32 %v794_v30  ;;  %vm762_vm0 = vweird.f32 %v1441_v31  ;;  %v806_v61 = vand.u32 2147483648, %v794_v30 }
 0x1bb   : > { %v776_v34 = vmul.f32 %v1443_v32, %v774_v23  ;;  %1446 = vtanh.f32 %v750_v29  ;;  %vm781_vm1 = vweird.f32 %v1443_v32  ;;  %vm763_vm4 = vmor %vm761_vm2, %vm762_vm0  ;;  %vm800_vm9 = vweird.f32 %v794_v30 }
 0x1bc   : > { %v758_v35 = vsub.f32 1.0, %v757_v33  ;;  %vm782_vm5 = vmor %vm780_vm3, %vm781_vm1  ;;  %v804_v62 = vand.u32 2147483647, %v794_v30  ;;  %v807_v0 = vor.u32 1.1754944e-38, %v806_v61 }
 0x1bd   : > { %v777_v36 = vsub.f32 1.0, %v776_v34 }
 0x1be   : > { %v759_v39 = vmul.f32 %v1441_v31, %v758_v35  ;;  %vm805_vm11 = vcmp.eq.f32.partialorder %v804_v62, 8.507059e+37 }
 0x1bf   : > { %v778_v41 = vmul.f32 %v1443_v32, %v777_v36 }
 0x1c0   : > { %v1445_v43 = vpop.eup %1444  ;;  %v760_v44 = vadd.f32 %v1441_v31, %v759_v39 }
 0x1c1   : > { %v1447_v45 = vpop.eup %1446  ;;  %v796_v46 = vmul.f32 %v1445_v43, %v794_v30  ;;  %v779_v48 = vadd.f32 %v1443_v32, %v778_v41  ;;  %vm801_vm8 = vweird.f32 %v1445_v43 }
 0x1c2   : > { %v764_v51 = vsel %vm763_vm4, %v1441_v31, %v760_v44  ;;  %vm802_vm10 = vmor %vm800_vm9, %vm801_vm8 }
 0x1c3   : > { %v797_v52 = vsub.f32 1.0, %v796_v46  ;;  %v769_v53 = vsel %vm766_vm6, %v768_v47, %v764_v51  ;;  %v783_v54 = vsel %vm782_vm5, %v1443_v32, %v779_v48 }
 0x1c4   : > { %v788_v55 = vsel %vm785_vm7, %v787_v49, %v783_v54  ;;  %v811_v56 = vmul.f32 %v1447_v45, %v769_v53 }
 0x1c5   : > { %v798_v57 = vmul.f32 %v1445_v43, %v797_v52  ;;  %v810_v58 = vmul.f32 %v788_v55, %v589_v50 }
 0x1c7   : > { %v812_v59 = vadd.f32 %v811_v56, %v810_v58  ;;  %v799_v60 = vadd.f32 %v1445_v43, %v798_v57 }
 0x1c9   : > { %1448 = vtanh.f32 %v812_v59  ;;  %816 = vst [vmem:[#allocation20] sm:$0xff] %v812_v59  ;;  %v803_v63 = vsel %vm802_vm10, %v1445_v43, %v799_v60 }
 0x1ca   : > { %v808_v2 = vsel %vm805_vm11, %v807_v0, %v803_v63 }
 0x1cf   : > { %v1449_v1 = vpop.eup %1448 }
 0x1d0   : > { %v814_v3 = vmul.f32 %v1449_v1, %v808_v2 }
 0x1d2   : > { %815 = vst [vmem:[#allocation18] sm:$0xff] %v814_v3  ;;  %v817_v4 = vpack.c.bf16 %v814_v3, %v814_v3 }
 0x1d4   : > { %819 = vst.msk [vmem:[#allocation3] sm:$0xf] %vm818_vm12, %v817_v4 }
 0x1d5 PF: > { %v1267_v5 = vld [vmem:[%s2235_s15 + $0x20] sm:$0xf]  ;;  %v1309_v6 = vld [vmem:[%s2235_s15 + $0x2c] sm:$0xf0]  ;;  %v1307_v7 = vld [vmem:[%s2235_s15 + $0x24] sm:$0xf] }
 0x1d6   : > { %v1268_v8 = vor.u32 %v1309_v6, %v1267_v5  ;;  %v1269_v9 = vld [vmem:[%s2235_s15 + $0x30] sm:$0xf0]  ;;  %v1275_v10 = vld [vmem:[%s2235_s15 + $0x28] sm:$0xf]  ;;  %v1310_v11 = vld [vmem:[%s2235_s15 + $0x34] sm:$0xf0] }
 0x1d7   : > { %v1272_v12 = vor.u32 %v1307_v7, %v1269_v9  ;;  %v1276_v13 = vor.u32 %v1310_v11, %v1275_v10  ;;  %v1308_v14 = vld [vmem:[%s2235_s15 + $0x2c] sm:$0xf]  ;;  %v1277_v15 = vld [vmem:[%s2235_s15 + $0x38] sm:$0xf0]  ;;  %v1251_v16 = vld [vmem:[%s2235_s15] sm:$0xf] }
 0x1d8   : > { %889 = vmatpush.bf16.msra.mxu0 %v1268_v8  ;;  %v1280_v17 = vor.u32 %v1308_v14, %v1277_v15  ;;  %v1305_v18 = vld [vmem:[%s2235_s15 + $0xc] sm:$0xf0]  ;;  %v1303_v19 = vld [vmem:[%s2235_s15 + $0x4] sm:$0xf]  ;;  %v1253_v20 = vld [vmem:[%s2235_s15 + $0x10] sm:$0xf0] }
 0x1d9   : > { %902 = vmatpush.bf16.msra.mxu1 %v1272_v12  ;;  %915 = vmatpush.bf16.msra.mxu2 %v1276_v13  ;;  %v1252_v21 = vor.u32 %v1305_v18, %v1251_v16  ;;  %v1256_v22 = vor.u32 %v1303_v19, %v1253_v20  ;;  %v1259_v23 = vld [vmem:[%s2235_s15 + $0x8] sm:$0xf]  ;;  %v1306_v24 = vld [vmem:[%s2235_s15 + $0x14] sm:$0xf0]  ;;  %v1304_v25 = vld [vmem:[%s2235_s15 + $0xc] sm:$0xf] }
 0x1da   : > { %928 = vmatpush.bf16.msra.mxu3 %v1280_v17  ;;  %v1260_v26 = vor.u32 %v1306_v24, %v1259_v23  ;;  %v1261_v27 = vld [vmem:[%s2235_s15 + $0x18] sm:$0xf0]  ;;  %vm879_vm13 = vcmask 261120   ;;  %s967_s12 = sshll.u32 %s2462_s9, 4  ;;  %s2016_s15 = smov [#allocation18]   ;;  %s968_s12 = int_to_ptr.hbm [resolvable:$true] %s967_s12 }
 0x1db   : > { %v1264_v28 = vor.u32 %v1304_v25, %v1261_v27  ;;  %v820_v29 = vld [vmem:[#allocation3] sm:$0xf]  ;;  %s965_s5 = sshll.u32 %s2016_s15, 4  ;;  %p2534_p3 = scmp.eq.s32.totalorder %s2097_s0, 2  ;;  %v829_v30 = vld [vmem:[%s2242_s23] sm:$0xf]  ;;  %s966_s5 = int_to_ptr.vmem [resolvable:$true] %s965_s5 }
 0x1dc   : > { %890 = vmatpush.bf16.msra.mxu0 %v1252_v21  ;;  %s979_s22 = sshll.u32 %s2463_s10, 4  ;;  %s2017_s28 = smov [#allocation20]   ;;  %v831_v31 = vperm.slane %v829_v30, 0  ;;  %v832_v32 = vperm.slane %v829_v30, 1  ;;  %v833_v37 = vperm.slane %v829_v30, 2  ;;  %v834_v38 = vperm.slane %v829_v30, 3  ;;  %s980_s22 = int_to_ptr.hbm [resolvable:$true] %s979_s22 }
 0x1dd   : > { %903 = vmatpush.bf16.msra.mxu1 %v1256_v22  ;;  %916 = vmatpush.bf16.msra.mxu2 %v1260_v26  ;;  %1334 = dma.vmem_to_hbm [thread:$0]  (%p2534_p3), %s966_s5, 128, %s968_s12, [#allocation19]  }
 0x1de   : > { %929 = vmatpush.bf16.msra.mxu3 %v1264_v28  ;;  %s977_s3 = sshll.u32 %s2017_s28, 4  ;;  %p2535_p4 = pmov %p2534_p3  ;;  %s978_s3 = int_to_ptr.vmem [resolvable:$true] %s977_s3 }
 0x1df   : > { %1281 = vmatmul.msk.bf16.vlgmr.msra.gmra.mxu0 %vm879_vm13, %v820_v29  ;;  %s1311_s2 = sshll.u32 %s2097_s0, 5  ;;  %s2536_s4 = sld [smem:[#allocation61_spill]] }
 0x1e0   : > { %1282 = vmatmul.msk.bf16.vlgmr.msra.gmra.mxu1 %vm879_vm13, %v820_v29  ;;  %1283 = vmatmul.msk.bf16.vlgmr.msra.gmra.mxu2 %vm879_vm13, %v820_v29  ;;  %1336 = dma.vmem_to_hbm [thread:$0]  (%p2535_p4), %s978_s3, 128, %s980_s22, [#allocation19]  }
 0x1e1   : > { %1284 = vmatmul.msk.bf16.vlgmr.msra.gmra.mxu3 %vm879_vm13, %v820_v29  ;;  %s953_s18 = sshll.u32 %s2253_s27, 4  ;;  %s940_s19 = scalar_lea.sflag [#allocation9], %s2232_s24  ;;  %s954_s18 = int_to_ptr.vmem [resolvable:$true] %s953_s18 }
 0x1e5   : > { %s951_s29 = scalar_lea.hbm %s2536_s4, %s1311_s2  ;;  %s1910_s25 = scalar_lea.hbm %s2536_s4, 96 }
 0x1e6   : > { %s955_s23 = sshll.u32 %s951_s29, 4  ;;  %s956_s23 = int_to_ptr.hbm [resolvable:$true] %s955_s23 }
 0x1e7   : > { %s1904_s21 = sshra.s32 %s956_s23, 4  ;;  %s1905_s21 = int_to_ptr.hbm [resolvable:$true] %s1904_s21 }
 0x1e8   : > { %s1906_s13 = scalar_lea.hbm %s1905_s21, 32  ;;  %p1911_p1 = scmp.lt.s32.totalorder %s1905_s21, %s2536_s4 }
 0x1e9   : > { %p1907_p7 = scmp.ne.s32.totalorder %s1905_s21, %s1906_s13  ;;  %p1912_p0 = scmp.lt.s32.totalorder %s1910_s25, %s1906_s13 }
 0x1eb   : > { %p1908_p13 = pnand %p1907_p7, %p2130_p11  ;;  %p1913_p6 = por %p1912_p0, %p1911_p1 }
 0x1ed   : > { %p1909_p8 = pneg %p1908_p13 }
 0x1ef   : > { %p1914_p5 = pnand %p1913_p6, %p1909_p8 }
 0x25c   : > { %v892_v33 = vpop.f32.mrf.mxu0 }
 0x25d   : > { %v893_v34 = vadd.f32 %v892_v33, %v831_v31  ;;  %v905_v35 = vpop.f32.mrf.mxu1 }
 0x25e   : > { %v906_v36 = vadd.f32 %v905_v35, %v832_v32 }
 0x25f   : > { %935 = vst [vmem:[%s2253_s27] sm:$0xff] %v893_v34 }
 0x260   : > { %936 = vst [vmem:[%s2253_s27 + $0x8] sm:$0xff] %v906_v36 }
 0x263   : > { %v918_v39 = vpop.f32.mrf.mxu2 }
 0x264   : > { %v919_v40 = vadd.f32 %v918_v39, %v833_v37  ;;  %v931_v41 = vpop.f32.mrf.mxu3  ;;  %v894_v42 = vpop.f32.mrf.mxu0 }
 0x265   : > { %v932_v43 = vadd.f32 %v931_v41, %v834_v38  ;;  %v907_v44 = vpop.f32.mrf.mxu1 }
 0x266   : > { %937 = vst [vmem:[%s2253_s27 + $0x10] sm:$0xff] %v919_v40 }
 0x267   : > { %938 = vst [vmem:[%s2253_s27 + $0x18] sm:$0xff] %v932_v43 }
 0x268   : > { %1917 = shalt.err (!%p1914_p5)
}
 0x269   : > { %1332 = dma.vmem_to_hbm [thread:$0]  (%p2130_p11), %s954_s18, 512, %s956_s23, %s940_s19  }
 0x26a   : > { %p2538_p10 = pmov %p2534_p3 }
 0x26b   : > { %v920_v45 = vpop.f32.mrf.mxu2 }
 0x26c   : > { %v933_v46 = vpop.f32.mrf.mxu3 }
 0x26d   : > { %1973 = dma.done.wait (%p2538_p10), [#allocation19], 256   ;;  %p2539_p2 = pmov %p2534_p3 }
 0x26f   : > { %1975 = vsyncadd (%p2539_p2), [#allocation19], 4294967040 }
 0x270 PF: > { %s2540_s24 = sld [smem:[#allocation45_spill]]  ;;  %p1379_p9 = scmp.ge.s32.totalorder %s1994_s20, 2 }
 0x272   : > { %p1363_p3 = pnand %p1379_p9, %p2134_p12 }
 0x274   : > { %p1364_p4 = pneg %p1363_p3 }
 0x276   : > { %s1001_s12 = sand.u32 1, %s2540_s24  }
 0x277   : > { %s1002_s15 = scalar_lea.sflag [#allocation9], %s1001_s12 }
 0x278   : > { %1977 = dma.done.wait (%p1364_p4), %s1002_s15, 512  }
 0x279   : > { %1979 = vsyncadd (%p1364_p4), %s1002_s15, 4294966784  ;;  %s2542_s20 = sld [smem:[#allocation48_spill]] }
 0x27a   : > { %s2543_s17 = sld [smem:[#allocation46_spill]] }
 0x27b   : > { %s2544_s18 = sld [smem:[#allocation47_spill]] }
 0x27c   : > { %s2545_s19 = sld [smem:[#allocation49_spill]] }
 0x27f   : > { %p33_p11 = scmp.ge.s32.totalorder %s2542_s20, 5  }
 0x281   :  { %35 = sbr.rel (!%p33_p11) target bundleno = 19 (0x13), region = 164 }
 0x286   :  { %1008 = vsyncpa [#allocation8], 1 }
 0x287   :  { %1010 = vsyncpa [#allocation8 + $0x1], 1 }
 0x288   :  { %1011 = vsyncpa [#allocation11], 1 }
 0x289   :  { %1012 = vsyncpa [#allocation16], 1 }
 0x28a   :  { %1013 = vsyncpa [#allocation9], 1 }
 0x28b   :  { %1015 = vsyncpa [#allocation9 + $0x1], 1 }
 0x28c   :  { %1016 = vsyncpa [#allocation19], 1 }
 0x28d   :  { %1017 = vsyncmov [#allocation4] }
 0x290   :  { %s1018_s0 = vpop.sfrf %1017 }
 0x291   :  { %p1294_p12 = scmp.ne.s32.totalorder %s1018_s0, 0 }
 0x293   :  { %1022 = shalt.err (%p1294_p12)  }
 0x294   :  { %1024 = vsyncmov [#allocation4 + $0x1] }
 0x297   :  { %s1025_s5 = vpop.sfrf %1024 }
 0x298   :  { %p1295_p7 = scmp.ne.s32.totalorder %s1025_s5, 0 }
 0x29a   :  { %1029 = shalt.err (%p1295_p7)  }
 0x29b   :  { %1031 = vsyncmov [#allocation4 + $0x2] }
 0x29e   :  { %s1032_s16 = vpop.sfrf %1031 }
 0x29f   :  { %p1296_p13 = scmp.ne.s32.totalorder %s1032_s16, 0 }
 0x2a1   :  { %1036 = shalt.err (%p1296_p13)  }
 0x2a2   :  { %1038 = vsyncmov [#allocation4 + $0x3] }
 0x2a5   :  { %s1039_s1 = vpop.sfrf %1038 }
 0x2a6   :  { %p1297_p8 = scmp.ne.s32.totalorder %s1039_s1, 0 }
 0x2a8   :  { %1043 = shalt.err (%p1297_p8)  }
 0x2a9   :  { %1045 = vsyncmov [#allocation4 + $0x4] }
 0x2ac   :  { %s1046_s9 = vpop.sfrf %1045 }
 0x2ad   :  { %p1298_p1 = scmp.ne.s32.totalorder %s1046_s9, 0 }
 0x2af   :  { %1050 = shalt.err (%p1298_p1)  }
 0x2b0   :  { %1052 = vsyncmov [#allocation4 + $0x5] }
 0x2b3   :  { %s1053_s10 = vpop.sfrf %1052 }
 0x2b4   :  { %p1299_p0 = scmp.ne.s32.totalorder %s1053_s10, 0 }
 0x2b6   :  { %1057 = shalt.err (%p1299_p0)  }
 0x2b7   :  { %1059 = vsyncmov [#allocation4 + $0x6] }
 0x2ba   :  { %s1060_s20 = vpop.sfrf %1059 }
 0x2bb   :  { %p1300_p6 = scmp.ne.s32.totalorder %s1060_s20, 0 }
 0x2bd   :  { %1064 = shalt.err (%p1300_p6)  }
 0x2be   :  { %1066 = vsyncmov [#allocation4 + $0x7] }
 0x2c1   :  { %s1067_s26 = vpop.sfrf %1066 }
 0x2c2   :  { %p1301_p5 = scmp.ne.s32.totalorder %s1067_s26, 0 }
 0x2c4   :  { %1071 = shalt.err (%p1301_p5)  }

</bundles_post_ra>
